<compile_context>
chip_gen: v5e
topology: v5e:2x2
jax: 0.10.0
libtpu: 0.0.40
codegen_flags: <defaults>
</compile_context>

<pallas_src>
import functools

import jax
import jax.numpy as jnp
from jax.experimental import pallas as pl
from jax.experimental.pallas import tpu as pltpu


_BN_EPS = 1e-5
_VMEM_LIMIT = 40 * 1024 * 1024   # safe on v7x (64 MiB physical); fine on v5e/v6e
_TARGET_PIXELS = 512             # output pixels per conv grid step


def _round_up(x, m):
    return ((x + m - 1) // m) * m


def _pick_row_tile(ho, wo, target=_TARGET_PIXELS):
    """Largest divisor TH of ho with TH*wo <= target (falls back to 1)."""
    best = 1
    for th in range(1, ho + 1):
        if ho % th == 0 and th * wo <= target:
            best = th
    return best


# ---------------------------------------------------------------------------
# Kernel 1: stride-2 3x3 conv for one (TH*Wo, Cp) output tile as a single
# long-K (K = 9*Cp) bf16 MXU matmul over taps staged in VMEM, plus per-tile
# BatchNorm partial statistics from the f32 accumulator.
# ---------------------------------------------------------------------------
def _conv_stats_kernel(xp_ref, w_ref, y_ref, st_ref, col_ref, *, th, wo, cp):
    # xp_ref : (1, 1, 6, (TH+1)*Wo, Cp) bf16  halo'd tap planes, rows flattened.
    #          plane index = (kh % 2) * 3 + kw ; row offset = (kh // 2) * Wo.
    # w_ref  : (9*Cp, Cp) bf16                weights, K-concatenated over taps.
    # y_ref  : (1, 1, TH*Wo, Cp) bf16         conv output tile.
    # st_ref : (1, 1, 8, Cp) f32              row 0: sum, row 1: sum of squares.
    # col_ref: (TH*Wo, 9*Cp) bf16 VMEM        im2col staging scratch.
    m = th * wo
    # Stage the 9 taps into the K-concatenated scratch.  Every copy is a
    # static row slice (offset 0 or Wo) plus a lane-aligned column store, so
    # no sublane-misaligned gathers or per-tap reshapes are generated.
    for kh in range(3):
        row0 = (kh // 2) * wo
        for kw in range(3):
            k = kh * 3 + kw
            plane = (kh % 2) * 3 + kw
            col_ref[:, k * cp:(k + 1) * cp] = xp_ref[0, 0, plane,
                                                     row0:row0 + m, :]

    # One long-K MXU matmul with f32 accumulation (accumulation stays in MXU).
    acc = jnp.dot(col_ref[...], w_ref[...], preferred_element_type=jnp.float32)

    y_ref[0, 0, :, :] = acc.astype(y_ref.dtype)

    # BatchNorm partial statistics (indexed stores; rows 2..7 never read).
    st_ref[0, 0, 0:1, :] = jnp.sum(acc, axis=0, keepdims=True)
    st_ref[0, 0, 1:2, :] = jnp.sum(acc * acc, axis=0, keepdims=True)


# ---------------------------------------------------------------------------
# Kernel 2: lane-dense normalize + affine + ReLU over (TH*Wo, Cp) tiles.
# ---------------------------------------------------------------------------
def _bn_relu_kernel(y_ref, s_ref, b_ref, o_ref):
    o_ref[...] = jnp.maximum(
        y_ref[...].astype(jnp.float32) * s_ref[...] + b_ref[...], 0.0)


# ---------------------------------------------------------------------------
# Forward pass of DownsampleConv.
# ---------------------------------------------------------------------------
@jax.jit
def downsample_conv_forward(x_nchw, w_oihw, gamma, beta):
    """Conv2d(C,C,3,s=2,p=1,bias=False) -> BatchNorm2d(C) (batch stats) -> ReLU."""
    N, C, H, W = x_nchw.shape
    assert H % 2 == 0 and W % 2 == 0, "even spatial sizes only"
    # TODO(synk): odd H/W needs a different tap-plane extraction (PyTorch
    # supports odd sizes); not implemented here.
    Ho, Wo = H // 2, W // 2
    Cp = _round_up(C, 128)
    # TODO(synk): for C << 128 the channel padding wastes MXU FLOPs / HBM
    # (worst on v5e); a pixels-on-lanes layout would be needed for a fast
    # small-C path.
    TH = _pick_row_tile(Ho, Wo)
    nH = Ho // TH
    M = TH * Wo

    # -- host-side glue (fused by XLA): pad, cast bf16, tap-plane repack -----
    # TODO(synk): the NCHW<->NHWC transposes and the final [..., :C] slice are
    # extra HBM passes; they disappear if callers provide/accept NHWC.
    xh = jnp.transpose(x_nchw, (0, 2, 3, 1))                       # NHWC
    xh = jnp.pad(xh, ((0, 0), (1, 1), (1, 1), (0, Cp - C)))
    xh = xh.astype(jnp.bfloat16)
    # 6 tap planes: (parity p of kh) x (kw in 0..2):
    #   plane[p*3+kw][i, j, :] = xpad[2i+p, 2j+kw, :], i in [0,Ho], j in [0,Wo)
    planes = [
        jax.lax.slice(xh, (0, p, kw, 0),
                      (N, p + 2 * Ho + 1, kw + 2 * Wo - 1, Cp),
                      (1, 2, 2, 1))
        for p in range(2) for kw in range(3)
    ]
    planes = jnp.stack(planes, axis=1)                             # (N,6,Ho+1,Wo,Cp)
    # Row tiles with a one-row halo (tile t covers plane rows [t*TH, t*TH+TH]).
    tiles = jnp.stack(
        [jax.lax.slice_in_dim(planes, t * TH, t * TH + TH + 1, axis=2)
         for t in range(nH)], axis=1)                              # (N,nH,6,TH+1,Wo,Cp)
    xp = tiles.reshape(N, nH, 6, (TH + 1) * Wo, Cp)

    # Weights OIHW -> (kh*3+kw, Cin, Cout) -> K-concatenated (9*Cp, Cp), bf16.
    wm = jnp.transpose(w_oihw, (2, 3, 1, 0)).reshape(9, C, C)
    wm = jnp.pad(wm, ((0, 0), (0, Cp - C), (0, Cp - C)))
    wm = wm.astype(jnp.bfloat16).reshape(9 * Cp, Cp)

    kernel = functools.partial(_conv_stats_kernel, th=TH, wo=Wo, cp=Cp)
    y, stats = pl.pallas_call(
        kernel,
        out_shape=(jax.ShapeDtypeStruct((N, nH, M, Cp), jnp.bfloat16),
                   jax.ShapeDtypeStruct((N, nH, 8, Cp), jnp.float32)),
        grid=(N, nH),
        in_specs=[
            pl.BlockSpec((1, 1, 6, (TH + 1) * Wo, Cp),
                         lambda n, h: (n, h, 0, 0, 0)),
            # Constant index_map -> fetched once across the whole grid.  (A
            # second idle VMEM buffer is still reserved by default
            # double-buffering; pl.Buffered(1) would reclaim it.)
            pl.BlockSpec((9 * Cp, Cp), lambda n, h: (0, 0)),
        ],
        out_specs=(
            pl.BlockSpec((1, 1, M, Cp), lambda n, h: (n, h, 0, 0)),
            pl.BlockSpec((1, 1, 8, Cp), lambda n, h: (n, h, 0, 0)),
        ),
        scratch_shapes=[pltpu.VMEM((M, 9 * Cp), jnp.bfloat16)],
        compiler_params=pltpu.CompilerParams(
            dimension_semantics=("parallel", "parallel"),
            vmem_limit_bytes=_VMEM_LIMIT),
    )(xp, wm)

    # -- BatchNorm batch statistics (train mode, biased variance) ------------
    # Chan parallel-variance combine of per-tile (sum, sumsq): much better
    # conditioned than a single global E[x^2] - E[x]^2.
    n_t = jnp.float32(M)
    s = stats[:, :, 0, :].reshape(N * nH, Cp)
    q = stats[:, :, 1, :].reshape(N * nH, Cp)
    cnt = jnp.float32(N * nH * M)
    mean_t = s / n_t
    m2_t = jnp.maximum(q - s * mean_t, 0.0)          # per-tile sum of sq. dev.
    mean = jnp.sum(s, axis=0) / cnt
    m2 = jnp.sum(m2_t, axis=0) + n_t * jnp.sum((mean_t - mean) ** 2, axis=0)
    var = m2 / cnt
    inv = jax.lax.rsqrt(var + _BN_EPS)
    scale = jnp.pad(gamma, (0, Cp - C)) * inv
    bias = jnp.pad(beta, (0, Cp - C)) - mean * scale

    # -- normalize + affine + ReLU over the same lane-dense tiles ------------
    out3 = pl.pallas_call(
        _bn_relu_kernel,
        out_shape=jax.ShapeDtypeStruct((N * nH, M, Cp), jnp.float32),
        grid=(N * nH,),
        in_specs=[
            pl.BlockSpec((1, M, Cp), lambda i: (i, 0, 0)),
            pl.BlockSpec((1, Cp), lambda i: (0, 0)),
            pl.BlockSpec((1, Cp), lambda i: (0, 0)),
        ],
        out_specs=pl.BlockSpec((1, M, Cp), lambda i: (i, 0, 0)),
        compiler_params=pltpu.CompilerParams(
            dimension_semantics=("parallel",),
            vmem_limit_bytes=_VMEM_LIMIT),
    )(y.reshape(N * nH, M, Cp), scale.reshape(1, Cp), bias.reshape(1, Cp))
    # TODO(synk): could alias this output onto y's HBM buffer via
    # input_output_aliases if the stored dtypes matched (y is bf16, out f32).

    out = out3.reshape(N, Ho, Wo, Cp)[..., :C]
    return jnp.transpose(out, (0, 3, 1, 2))                        # NCHW


# ---------------------------------------------------------------------------
# Plain-JAX reference (for correctness checking).
# ---------------------------------------------------------------------------
def _reference(x, w, gamma, beta):
    y = jax.lax.conv_general_dilated(
        x, w, window_strides=(2, 2), padding=((1, 1), (1, 1)),
        dimension_numbers=("NCHW", "OIHW", "NCHW"),
        precision=jax.lax.Precision.HIGHEST)
    mean = jnp.mean(y, axis=(0, 2, 3), keepdims=True)
    var = jnp.mean((y - mean) ** 2, axis=(0, 2, 3), keepdims=True)
    yh = (y - mean) * jax.lax.rsqrt(var + _BN_EPS)
    out = yh * gamma.reshape(1, -1, 1, 1) + beta.reshape(1, -1, 1, 1)
    return jnp.maximum(out, 0.0)


if __name__ == "__main__":
    key = jax.random.PRNGKey(0)
    kx, kwt, kg, kb = jax.random.split(key, 4)

    N, C, H, W = 2, 4, 16, 16
    x = jax.random.normal(kx, (N, C, H, W), jnp.float32)
    w = 0.1 * jax.random.normal(kwt, (C, C, 3, 3), jnp.float32)
    gamma = 1.0 + 0.1 * jax.random.normal(kg, (C,), jnp.float32)
    beta = 0.1 * jax.random.normal(kb, (C,), jnp.float32)

    out = downsample_conv_forward(x, w, gamma, beta)
    out = jax.block_until_ready(out)

    assert out.shape == (N, C, H // 2, W // 2), out.shape
    assert out.dtype == jnp.float32
    assert bool(jnp.all(jnp.isfinite(out)))
    assert bool(jnp.all(out >= 0.0))          # ends in ReLU

    ref = _reference(x, w, gamma, beta)
    err = float(jnp.max(jnp.abs(out - ref)))
    assert err < 0.1, f"max |out - ref| = {err}"

    print("KERNEL_OK")
</pallas_src>

<mosaic_0001>
module attributes {stable_mosaic.version = 11 : i64} {
  func.func @_conv_stats_kernel(%arg0: i32, %arg1: i32, %arg2: memref<1x1x6x72x128xbf16, #tpu.memory_space<vmem>>, %arg3: memref<1152x128xbf16, #tpu.memory_space<vmem>>, %arg4: memref<1x1x64x128xbf16, #tpu.memory_space<vmem>>, %arg5: memref<1x1x8x128xf32, #tpu.memory_space<vmem>>, %arg6: memref<64x1152xbf16, #tpu.memory_space<vmem>>) attributes {dimension_semantics = [#tpu.dimension_semantics<parallel>, #tpu.dimension_semantics<parallel>], iteration_bounds = array<i64: 2, 1>, scalar_prefetch = 0 : i64, scratch_operands = 1 : i64, tpu.core_type = #tpu.core_type<tc>, window_params = [{transform_indices = @transform_0, window_bounds = array<i64: 1, 1, 6, 72, 128>}, {pipeline_mode = #tpu.pipeline_mode<synchronous>, transform_indices = @transform_1, window_bounds = array<i64: 1152, 128>}, {transform_indices = @transform_2, window_bounds = array<i64: 1, 1, 64, 128>}, {transform_indices = @transform_3, window_bounds = array<i64: 1, 1, 8, 128>}]} {
    %c0 = arith.constant 0 : index
    %c0_0 = arith.constant 0 : index
    %c0_1 = arith.constant 0 : index
    %c0_2 = arith.constant 0 : index
    %c0_3 = arith.constant 0 : index
    %0 = vector.load %arg2[%c0, %c0_0, %c0_1, %c0_2, %c0_3] : memref<1x1x6x72x128xbf16, #tpu.memory_space<vmem>>, vector<1x1x1x64x128xbf16>
    %1 = vector.shape_cast %0 : vector<1x1x1x64x128xbf16> to vector<64x128xbf16>
    %c0_4 = arith.constant 0 : index
    %c0_5 = arith.constant 0 : index
    %2 = vector.load %arg6[%c0_4, %c0_5] : memref<64x1152xbf16, #tpu.memory_space<vmem>>, vector<64x128xbf16>
    tpu.vector_store %arg6[%c0_4, %c0_5], %1 {strides = array<i32>} : memref<64x1152xbf16, #tpu.memory_space<vmem>>, vector<64x128xbf16>,
    %c0_6 = arith.constant 0 : index
    %c0_7 = arith.constant 0 : index
    %c1 = arith.constant 1 : index
    %c0_8 = arith.constant 0 : index
    %c0_9 = arith.constant 0 : index
    %3 = vector.load %arg2[%c0_6, %c0_7, %c1, %c0_8, %c0_9] : memref<1x1x6x72x128xbf16, #tpu.memory_space<vmem>>, vector<1x1x1x64x128xbf16>
    %4 = vector.shape_cast %3 : vector<1x1x1x64x128xbf16> to vector<64x128xbf16>
    %c0_10 = arith.constant 0 : index
    %c128 = arith.constant 128 : index
    %5 = vector.load %arg6[%c0_10, %c128] : memref<64x1152xbf16, #tpu.memory_space<vmem>>, vector<64x128xbf16>
    tpu.vector_store %arg6[%c0_10, %c128], %4 {strides = array<i32>} : memref<64x1152xbf16, #tpu.memory_space<vmem>>, vector<64x128xbf16>,
    %c0_11 = arith.constant 0 : index
    %c0_12 = arith.constant 0 : index
    %c2 = arith.constant 2 : index
    %c0_13 = arith.constant 0 : index
    %c0_14 = arith.constant 0 : index
    %6 = vector.load %arg2[%c0_11, %c0_12, %c2, %c0_13, %c0_14] : memref<1x1x6x72x128xbf16, #tpu.memory_space<vmem>>, vector<1x1x1x64x128xbf16>
    %7 = vector.shape_cast %6 : vector<1x1x1x64x128xbf16> to vector<64x128xbf16>
    %c0_15 = arith.constant 0 : index
    %c256 = arith.constant 256 : index
    %8 = vector.load %arg6[%c0_15, %c256] : memref<64x1152xbf16, #tpu.memory_space<vmem>>, vector<64x128xbf16>
    tpu.vector_store %arg6[%c0_15, %c256], %7 {strides = array<i32>} : memref<64x1152xbf16, #tpu.memory_space<vmem>>, vector<64x128xbf16>,
    %c0_16 = arith.constant 0 : index
    %c0_17 = arith.constant 0 : index
    %c3 = arith.constant 3 : index
    %c0_18 = arith.constant 0 : index
    %c0_19 = arith.constant 0 : index
    %9 = vector.load %arg2[%c0_16, %c0_17, %c3, %c0_18, %c0_19] : memref<1x1x6x72x128xbf16, #tpu.memory_space<vmem>>, vector<1x1x1x64x128xbf16>
    %10 = vector.shape_cast %9 : vector<1x1x1x64x128xbf16> to vector<64x128xbf16>
    %c0_20 = arith.constant 0 : index
    %c384 = arith.constant 384 : index
    %11 = vector.load %arg6[%c0_20, %c384] : memref<64x1152xbf16, #tpu.memory_space<vmem>>, vector<64x128xbf16>
    tpu.vector_store %arg6[%c0_20, %c384], %10 {strides = array<i32>} : memref<64x1152xbf16, #tpu.memory_space<vmem>>, vector<64x128xbf16>,
    %c0_21 = arith.constant 0 : index
    %c0_22 = arith.constant 0 : index
    %c4 = arith.constant 4 : index
    %c0_23 = arith.constant 0 : index
    %c0_24 = arith.constant 0 : index
    %12 = vector.load %arg2[%c0_21, %c0_22, %c4, %c0_23, %c0_24] : memref<1x1x6x72x128xbf16, #tpu.memory_space<vmem>>, vector<1x1x1x64x128xbf16>
    %13 = vector.shape_cast %12 : vector<1x1x1x64x128xbf16> to vector<64x128xbf16>
    %c0_25 = arith.constant 0 : index
    %c512 = arith.constant 512 : index
    %14 = vector.load %arg6[%c0_25, %c512] : memref<64x1152xbf16, #tpu.memory_space<vmem>>, vector<64x128xbf16>
    tpu.vector_store %arg6[%c0_25, %c512], %13 {strides = array<i32>} : memref<64x1152xbf16, #tpu.memory_space<vmem>>, vector<64x128xbf16>,
    %c0_26 = arith.constant 0 : index
    %c0_27 = arith.constant 0 : index
    %c5 = arith.constant 5 : index
    %c0_28 = arith.constant 0 : index
    %c0_29 = arith.constant 0 : index
    %15 = vector.load %arg2[%c0_26, %c0_27, %c5, %c0_28, %c0_29] : memref<1x1x6x72x128xbf16, #tpu.memory_space<vmem>>, vector<1x1x1x64x128xbf16>
    %16 = vector.shape_cast %15 : vector<1x1x1x64x128xbf16> to vector<64x128xbf16>
    %c0_30 = arith.constant 0 : index
    %c640 = arith.constant 640 : index
    %17 = vector.load %arg6[%c0_30, %c640] : memref<64x1152xbf16, #tpu.memory_space<vmem>>, vector<64x128xbf16>
    tpu.vector_store %arg6[%c0_30, %c640], %16 {strides = array<i32>} : memref<64x1152xbf16, #tpu.memory_space<vmem>>, vector<64x128xbf16>,
    %c0_31 = arith.constant 0 : index
    %c0_32 = arith.constant 0 : index
    %c0_33 = arith.constant 0 : index
    %c8 = arith.constant 8 : index
    %c0_34 = arith.constant 0 : index
    %18 = vector.load %arg2[%c0_31, %c0_32, %c0_33, %c8, %c0_34] : memref<1x1x6x72x128xbf16, #tpu.memory_space<vmem>>, vector<1x1x1x64x128xbf16>
    %19 = vector.shape_cast %18 : vector<1x1x1x64x128xbf16> to vector<64x128xbf16>
    %c0_35 = arith.constant 0 : index
    %c768 = arith.constant 768 : index
    %20 = vector.load %arg6[%c0_35, %c768] : memref<64x1152xbf16, #tpu.memory_space<vmem>>, vector<64x128xbf16>
    tpu.vector_store %arg6[%c0_35, %c768], %19 {strides = array<i32>} : memref<64x1152xbf16, #tpu.memory_space<vmem>>, vector<64x128xbf16>,
    %c0_36 = arith.constant 0 : index
    %c0_37 = arith.constant 0 : index
    %c1_38 = arith.constant 1 : index
    %c8_39 = arith.constant 8 : index
    %c0_40 = arith.constant 0 : index
    %21 = vector.load %arg2[%c0_36, %c0_37, %c1_38, %c8_39, %c0_40] : memref<1x1x6x72x128xbf16, #tpu.memory_space<vmem>>, vector<1x1x1x64x128xbf16>
    %22 = vector.shape_cast %21 : vector<1x1x1x64x128xbf16> to vector<64x128xbf16>
    %c0_41 = arith.constant 0 : index
    %c896 = arith.constant 896 : index
    %23 = vector.load %arg6[%c0_41, %c896] : memref<64x1152xbf16, #tpu.memory_space<vmem>>, vector<64x128xbf16>
    tpu.vector_store %arg6[%c0_41, %c896], %22 {strides = array<i32>} : memref<64x1152xbf16, #tpu.memory_space<vmem>>, vector<64x128xbf16>,
    %c0_42 = arith.constant 0 : index
    %c0_43 = arith.constant 0 : index
    %c2_44 = arith.constant 2 : index
    %c8_45 = arith.constant 8 : index
    %c0_46 = arith.constant 0 : index
    %24 = vector.load %arg2[%c0_42, %c0_43, %c2_44, %c8_45, %c0_46] : memref<1x1x6x72x128xbf16, #tpu.memory_space<vmem>>, vector<1x1x1x64x128xbf16>
    %25 = vector.shape_cast %24 : vector<1x1x1x64x128xbf16> to vector<64x128xbf16>
    %c0_47 = arith.constant 0 : index
    %c1024 = arith.constant 1024 : index
    %26 = vector.load %arg6[%c0_47, %c1024] : memref<64x1152xbf16, #tpu.memory_space<vmem>>, vector<64x128xbf16>
    tpu.vector_store %arg6[%c0_47, %c1024], %25 {strides = array<i32>} : memref<64x1152xbf16, #tpu.memory_space<vmem>>, vector<64x128xbf16>,
    %c0_48 = arith.constant 0 : index
    %c0_49 = arith.constant 0 : index
    %27 = vector.load %arg6[%c0_48, %c0_49] : memref<64x1152xbf16, #tpu.memory_space<vmem>>, vector<64x1152xbf16>
    %c0_50 = arith.constant 0 : index
    %c0_51 = arith.constant 0 : index
    %28 = vector.load %arg3[%c0_50, %c0_51] : memref<1152x128xbf16, #tpu.memory_space<vmem>>, vector<1152x128xbf16>
    %cst = arith.constant dense<0.000000e+00> : vector<64x128xf32>
    %29 = tpu.matmul %27, %28, %cst {dimension_numbers = #tpu.dot_dimension_numbers<[1], [0], [0], [1], [0, 0, 1, 1], [], []>} : vector<64x1152xbf16>, vector<1152x128xbf16>, vector<64x128xf32> -> vector<64x128xf32>
    %30 = arith.truncf %29 : vector<64x128xf32> to vector<64x128xbf16>
    %c0_52 = arith.constant 0 : index
    %c0_53 = arith.constant 0 : index
    %c0_54 = arith.constant 0 : index
    %c0_55 = arith.constant 0 : index
    %31 = vector.load %arg4[%c0_52, %c0_53, %c0_54, %c0_55] : memref<1x1x64x128xbf16, #tpu.memory_space<vmem>>, vector<1x1x64x128xbf16>
    %32 = vector.shape_cast %31 : vector<1x1x64x128xbf16> to vector<64x128xbf16>
    %33 = vector.shape_cast %30 : vector<64x128xbf16> to vector<1x1x64x128xbf16>
    tpu.vector_store %arg4[%c0_52, %c0_53, %c0_54, %c0_55], %33 {strides = array<i32>} : memref<1x1x64x128xbf16, #tpu.memory_space<vmem>>, vector<1x1x64x128xbf16>,
    %cst_56 = arith.constant dense<0.000000e+00> : vector<128xf32>
    %34 = vector.multi_reduction <add>, %29, %cst_56 [0] : vector<64x128xf32> to vector<128xf32>
    %35 = vector.shape_cast %34 : vector<128xf32> to vector<1x128xf32>
    %c0_57 = arith.constant 0 : index
    %c0_58 = arith.constant 0 : index
    %c0_59 = arith.constant 0 : index
    %c0_60 = arith.constant 0 : index
    %36 = vector.load %arg5[%c0_57, %c0_58, %c0_59, %c0_60] : memref<1x1x8x128xf32, #tpu.memory_space<vmem>>, vector<1x1x1x128xf32>
    %37 = vector.shape_cast %36 : vector<1x1x1x128xf32> to vector<1x128xf32>
    %38 = vector.shape_cast %35 : vector<1x128xf32> to vector<1x1x1x128xf32>
    tpu.vector_store %arg5[%c0_57, %c0_58, %c0_59, %c0_60], %38 {strides = array<i32>} : memref<1x1x8x128xf32, #tpu.memory_space<vmem>>, vector<1x1x1x128xf32>,
    %39 = arith.mulf %29, %29 : vector<64x128xf32>
    %cst_61 = arith.constant dense<0.000000e+00> : vector<128xf32>
    %40 = vector.multi_reduction <add>, %39, %cst_61 [0] : vector<64x128xf32> to vector<128xf32>
    %41 = vector.shape_cast %40 : vector<128xf32> to vector<1x128xf32>
    %c0_62 = arith.constant 0 : index
    %c0_63 = arith.constant 0 : index
    %c1_64 = arith.constant 1 : index
    %c0_65 = arith.constant 0 : index
    %42 = vector.load %arg5[%c0_62, %c0_63, %c1_64, %c0_65] : memref<1x1x8x128xf32, #tpu.memory_space<vmem>>, vector<1x1x1x128xf32>
    %43 = vector.shape_cast %42 : vector<1x1x1x128xf32> to vector<1x128xf32>
    %44 = vector.shape_cast %41 : vector<1x128xf32> to vector<1x1x1x128xf32>
    tpu.vector_store %arg5[%c0_62, %c0_63, %c1_64, %c0_65], %44 {strides = array<i32>} : memref<1x1x8x128xf32, #tpu.memory_space<vmem>>, vector<1x1x1x128xf32>,
    return
  }
  func.func @transform_0(%arg0: i32, %arg1: i32) -> (i32, i32, i32, i32, i32) {
    %c0_i32 = arith.constant 0 : i32
    %c0_i32_0 = arith.constant 0 : i32
    %c0_i32_1 = arith.constant 0 : i32
    %c0_i32_2 = arith.constant 0 : i32
    return %arg0, %arg1, %c0_i32, %c0_i32_0, %c0_i32_1 : i32, i32, i32, i32, i32
  }
  func.func @transform_1(%arg0: i32, %arg1: i32) -> (i32, i32) {
    %c0_i32 = arith.constant 0 : i32
    %c0_i32_0 = arith.constant 0 : i32
    %c0_i32_1 = arith.constant 0 : i32
    return %c0_i32, %c0_i32_0 : i32, i32
  }
  func.func @transform_2(%arg0: i32, %arg1: i32) -> (i32, i32, i32, i32) {
    %c0_i32 = arith.constant 0 : i32
    %c0_i32_0 = arith.constant 0 : i32
    %c0_i32_1 = arith.constant 0 : i32
    return %arg0, %arg1, %c0_i32, %c0_i32_0 : i32, i32, i32, i32
  }
  func.func @transform_3(%arg0: i32, %arg1: i32) -> (i32, i32, i32, i32) {
    %c0_i32 = arith.constant 0 : i32
    %c0_i32_0 = arith.constant 0 : i32
    %c0_i32_1 = arith.constant 0 : i32
    return %arg0, %arg1, %c0_i32, %c0_i32_0 : i32, i32, i32, i32
  }
}

module attributes {stable_mosaic.version = 11 : i64} {
  func.func @_bn_relu_kernel(%arg0: i32, %arg1: memref<1x64x128xbf16, #tpu.memory_space<vmem>>, %arg2: memref<1x128xf32, #tpu.memory_space<vmem>>, %arg3: memref<1x128xf32, #tpu.memory_space<vmem>>, %arg4: memref<1x64x128xf32, #tpu.memory_space<vmem>>) attributes {dimension_semantics = [#tpu.dimension_semantics<parallel>], iteration_bounds = array<i64: 2>, scalar_prefetch = 0 : i64, scratch_operands = 0 : i64, tpu.core_type = #tpu.core_type<tc>, window_params = [{transform_indices = @transform_0, window_bounds = array<i64: 1, 64, 128>}, {pipeline_mode = #tpu.pipeline_mode<synchronous>, transform_indices = @transform_1, window_bounds = array<i64: 1, 128>}, {pipeline_mode = #tpu.pipeline_mode<synchronous>, transform_indices = @transform_2, window_bounds = array<i64: 1, 128>}, {transform_indices = @transform_3, window_bounds = array<i64: 1, 64, 128>}]} {
    %c0 = arith.constant 0 : index
    %c0_0 = arith.constant 0 : index
    %c0_1 = arith.constant 0 : index
    %0 = vector.load %arg1[%c0, %c0_0, %c0_1] : memref<1x64x128xbf16, #tpu.memory_space<vmem>>, vector<1x64x128xbf16>
    %1 = arith.extf %0 : vector<1x64x128xbf16> to vector<1x64x128xf32>
    %c0_2 = arith.constant 0 : index
    %c0_3 = arith.constant 0 : index
    %2 = vector.load %arg2[%c0_2, %c0_3] : memref<1x128xf32, #tpu.memory_space<vmem>>, vector<1x128xf32>
    %3 = vector.shape_cast %2 : vector<1x128xf32> to vector<1x1x128xf32>
    %4 = vector.broadcast %3 : vector<1x1x128xf32> to vector<1x64x128xf32>
    %5 = arith.mulf %1, %4 : vector<1x64x128xf32>
    %c0_4 = arith.constant 0 : index
    %c0_5 = arith.constant 0 : index
    %6 = vector.load %arg3[%c0_4, %c0_5] : memref<1x128xf32, #tpu.memory_space<vmem>>, vector<1x128xf32>
    %7 = vector.shape_cast %6 : vector<1x128xf32> to vector<1x1x128xf32>
    %8 = vector.broadcast %7 : vector<1x1x128xf32> to vector<1x64x128xf32>
    %9 = arith.addf %5, %8 : vector<1x64x128xf32>
    %cst = arith.constant 0.000000e+00 : f32
    %10 = vector.broadcast %cst : f32 to vector<1x64x128xf32>
    %11 = arith.maximumf %9, %10 : vector<1x64x128xf32>
    %c0_6 = arith.constant 0 : index
    %c0_7 = arith.constant 0 : index
    %c0_8 = arith.constant 0 : index
    %12 = vector.load %arg4[%c0_6, %c0_7, %c0_8] : memref<1x64x128xf32, #tpu.memory_space<vmem>>, vector<1x64x128xf32>
    tpu.vector_store %arg4[%c0_6, %c0_7, %c0_8], %11 {strides = array<i32>} : memref<1x64x128xf32, #tpu.memory_space<vmem>>, vector<1x64x128xf32>,
    return
  }
  func.func @transform_0(%arg0: i32) -> (i32, i32, i32) {
    %c0_i32 = arith.constant 0 : i32
    %c0_i32_0 = arith.constant 0 : i32
    %c0_i32_1 = arith.constant 0 : i32
    return %arg0, %c0_i32, %c0_i32_0 : i32, i32, i32
  }
  func.func @transform_1(%arg0: i32) -> (i32, i32) {
    %c0_i32 = arith.constant 0 : i32
    %c0_i32_0 = arith.constant 0 : i32
    %c0_i32_1 = arith.constant 0 : i32
    return %c0_i32, %c0_i32_0 : i32, i32
  }
  func.func @transform_2(%arg0: i32) -> (i32, i32) {
    %c0_i32 = arith.constant 0 : i32
    %c0_i32_0 = arith.constant 0 : i32
    %c0_i32_1 = arith.constant 0 : i32
    return %c0_i32, %c0_i32_0 : i32, i32
  }
  func.func @transform_3(%arg0: i32) -> (i32, i32, i32) {
    %c0_i32 = arith.constant 0 : i32
    %c0_i32_0 = arith.constant 0 : i32
    %c0_i32_1 = arith.constant 0 : i32
    return %arg0, %c0_i32, %c0_i32_0 : i32, i32, i32
  }
}

</mosaic_0001>

<bundles_post_ra>
// kernel: downsample_conv_forward.3
= control target key start
LH: loop header
LB: loop body
LE: loop exit
PB: predicated region body
PF: predicated region fallthrough
CT: control target
= control target key end

     0   :  { %s352_s12 = smov 0   ;;  %s379_s0 = inlined_call_operand.vmem [shape: bf16[2,64,128], index: 0, kind: input, shape index: {}]   ;;  %s380_s1 = inlined_call_operand.vmem [shape: f32[1,128], index: 1, kind: input, shape index: {}]   ;;  %s381_s2 = inlined_call_operand.vmem [shape: f32[1,128], index: 2, kind: input, shape index: {}]   ;;  %s382_s3 = inlined_call_operand.vmem [shape: f32[2,64,128], index: 3, kind: output, shape index: {}]  }
   0x1 LB: > { %s282_s13 = sadd.s32 4294967295, %s330_s12   ;;  %p286_p0 = scmp.ge.s32.totalorder %s330_s12, 1  ;;  %s330_s12 = sphi %s352_s12, %s13_s12  }
   0x2   : > { %p137_p1 = scmp.lt.s32.totalorder %s330_s12, 3 }
   0x4   : > { %p138_p2 = pnand %p286_p0, %p137_p1 }
   0x5   : > { %p161_p3 = scmp.lt.s32.totalorder (!%p138_p2), %s282_s13, 1 }
   0x6   : > { %141 = sbr.rel (%p138_p2) target bundleno = 31 (0x1f), region = 32 }
   0xb   : > { %s384_s13 = smov (!%p161_p3, %s282_s13), 1  ;;  %v322_v0 = vld [vmem:[%s380_s1] ss:$0 sm:$0xff] }
   0xc   : > { %s293_s14 = sshll.u32 %s384_s13, 5  ;;  %v323_v5 = vld [vmem:[%s381_s2] ss:$0 sm:$0xff]  ;;  %s294_s22 = sshll.u32 %s384_s13, 6 }
   0xd   : > { %s165_s17 = scalar_lea.vmem %s379_s0, %s293_s14  ;;  %s170_s25 = scalar_lea.vmem %s382_s3, %s294_s22 }
   0xe   : > { %v296_v1 = vld [vmem:[%s165_s17] sm:$0xff]   ;;  %v311_v2 = vld [vmem:[%s165_s17 + $0x8] sm:$0xff]   ;;  %v312_v3 = vld [vmem:[%s165_s17 + $0x10] sm:$0xff]  }
   0xf   : > { %v297_v4 = vunpack.c.l.bf16 %v296_v1  ;;  %v298_v6 = vunpack.c.h.bf16 %v296_v1  ;;  %v301_v7 = vunpack.c.l.bf16 %v311_v2  ;;  %v302_v8 = vunpack.c.h.bf16 %v311_v2  ;;  %v313_v9 = vld [vmem:[%s165_s17 + $0x18] sm:$0xff]  }
  0x10   : > { %v305_v10 = vunpack.c.l.bf16 %v312_v3  ;;  %v306_v11 = vunpack.c.h.bf16 %v312_v3  ;;  %v309_v12 = vunpack.c.l.bf16 %v313_v9  ;;  %v310_v13 = vunpack.c.h.bf16 %v313_v9 }
  0x11   : > { %v191_v14 = vmul.f32 %v322_v0, %v297_v4  ;;  %v192_v15 = vmul.f32 %v322_v0, %v298_v6  ;;  %v193_v16 = vmul.f32 %v322_v0, %v301_v7  ;;  %v194_v17 = vmul.f32 %v322_v0, %v302_v8 }
  0x12   : > { %v195_v18 = vmul.f32 %v322_v0, %v305_v10  ;;  %v196_v19 = vmul.f32 %v322_v0, %v306_v11  ;;  %v197_v20 = vmul.f32 %v322_v0, %v309_v12  ;;  %v198_v21 = vmul.f32 %v322_v0, %v310_v13 }
  0x13   : > { %v203_v22 = vadd.f32 %v323_v5, %v191_v14  ;;  %v204_v23 = vadd.f32 %v323_v5, %v192_v15  ;;  %v205_v24 = vadd.f32 %v323_v5, %v193_v16  ;;  %v206_v25 = vadd.f32 %v323_v5, %v194_v17 }
  0x14   : > { %v207_v26 = vadd.f32 %v323_v5, %v195_v18  ;;  %v208_v27 = vadd.f32 %v323_v5, %v196_v19  ;;  %v209_v31 = vadd.f32 %v323_v5, %v197_v20  ;;  %v210_v33 = vadd.f32 %v323_v5, %v198_v21 }
  0x15   : > { %v211_v28 = vmax.f32 %v203_v22, 0.0  ;;  %v212_v29 = vmax.f32 %v204_v23, 0.0  ;;  %v213_v30 = vmax.f32 %v205_v24, 0.0  ;;  %v214_v32 = vmax.f32 %v206_v25, 0.0 }
  0x16   : > { %v215_v34 = vmax.f32 %v207_v26, 0.0  ;;  %v216_v35 = vmax.f32 %v208_v27, 0.0  ;;  %v217_v36 = vmax.f32 %v209_v31, 0.0  ;;  %v218_v37 = vmax.f32 %v210_v33, 0.0 }
  0x17   : > { %219 = vst [vmem:[%s170_s25] sm:$0xff] %v211_v28 }
  0x18   : > { %220 = vst [vmem:[%s170_s25 + $0x8] sm:$0xff] %v212_v29 }
  0x19   : > { %221 = vst [vmem:[%s170_s25 + $0x10] sm:$0xff] %v213_v30 }
  0x1a   : > { %222 = vst [vmem:[%s170_s25 + $0x18] sm:$0xff] %v214_v32 }
  0x1b   : > { %223 = vst [vmem:[%s170_s25 + $0x20] sm:$0xff] %v215_v34 }
  0x1c   : > { %224 = vst [vmem:[%s170_s25 + $0x28] sm:$0xff] %v216_v35 }
  0x1d   : > { %225 = vst [vmem:[%s170_s25 + $0x30] sm:$0xff] %v217_v36 }
  0x1e   : > { %226 = vst [vmem:[%s170_s25 + $0x38] sm:$0xff] %v218_v37 }
  0x1f PF: > { %s13_s12 = sadd.s32 1, %s330_s12  }
  0x20   : > { %p10_p4 = scmp.ge.s32.totalorder %s13_s12, 4  }
  0x22   :  { %12 = sbr.rel (!%p10_p4) target bundleno = 1 (0x1), region = 62 }

// kernel: downsample_conv_forward.2
= control target key start
LH: loop header
LB: loop body
LE: loop exit
PB: predicated region body
PF: predicated region fallthrough
CT: control target
= control target key end

     0   :  { %s2337_s12 = smov 0   ;;  %s2339_s13 = smov 0   ;;  %s2714_s0 = inlined_call_operand.vmem [shape: bf16[2,1,6,72,128], index: 0, kind: input, shape index: {}]   ;;  %s2715_s1 = inlined_call_operand.vmem [shape: bf16[1152,128], index: 1, kind: input, shape index: {}]   ;;  %s2716_s2 = inlined_call_operand.vmem [shape: bf16[2,1,64,128], index: 2, kind: output, shape index: {0}]   ;;  %s2717_s3 = inlined_call_operand.vmem [shape: f32[2,1,8,128], index: 3, kind: output, shape index: {1}]  }
   0x1   :  { %s2341_s14 = smov 0  }
   0x2 LB: > { %s26_s15 = sadd.s32 1, %s2311_s13  ;;  %p1625_p0 = scmp.ge.s32.totalorder %s2315_s14, 1  ;;  %s2315_s14 = sphi %s2341_s14, %s14_s14   ;;  %s2311_s13 = sphi %s2339_s13, %s2719_s13   ;;  %s2307_s12 = sphi %s2337_s12, %s2718_s12  }
   0x3   : > { %p28_p1 = scmp.ge.s32.totalorder %s26_s15, 2  ;;  %p162_p2 = scmp.lt.s32.totalorder %s2315_s14, 3 }
   0x5   : > { %s2721_s15 = smov (%p28_p1, %s26_s15), 0  ;;  %p163_p3 = pnand %p1625_p0, %p162_p2 }
   0x6   : > { %p201_p4 = scmp.lt.s32.totalorder (!%p163_p3), %s2307_s12, 1 }
   0x7   : > { %166 = sbr.rel (%p163_p3) target bundleno = 347 (0x15b), region = 28 }
   0xc   : > { %v2164_v0 = vld [vmem:[%s2715_s1 + $0x38] sm:$0xff]  ;;  %v2163_v2 = vld [vmem:[%s2715_s1 + $0x30] sm:$0xff]  ;;  %s2723_s12 = smov (!%p201_p4, %s2307_s12), 1  ;;  %v2162_v6 = vld [vmem:[%s2715_s1 + $0x28] sm:$0xff] }
   0xd   : > { %v2180_v1 = vld [vmem:[%s2715_s1 + $0xb8] sm:$0xff]  ;;  %2252 = vmatpush.bf16.msra.mxu1 %v2164_v0  ;;  %1175 = vmatpush.bf16.msra.mxu0 %v2164_v0  ;;  %v2179_v3 = vld [vmem:[%s2715_s1 + $0xb0] sm:$0xff]  ;;  %s2268_s26 = smul.u32 216, %s2723_s12  ;;  %v2178_v7 = vld [vmem:[%s2715_s1 + $0xa8] sm:$0xff]  ;;  %s1629_s8 = sshll.u32 %s2723_s12, 3 }
   0xe   : > { %1233 = vmatpush.bf16.msra.mxu2 %v2180_v1  ;;  %v2188_v4 = vld [vmem:[%s2715_s1 + $0xf8] sm:$0xff]  ;;  %v2187_v5 = vld [vmem:[%s2715_s1 + $0xf0] sm:$0xff]  ;;  %v2161_v12 = vld [vmem:[%s2715_s1 + $0x20] sm:$0xff]  ;;  %s225_s11 = scalar_lea.vmem %s2717_s3, %s1629_s8 }
   0xf   : > { %1262 = vmatpush.bf16.msra.mxu3 %v2188_v4  ;;  %s2382_s6 = scalar_lea.vmem %s2714_s0, %s2268_s26  ;;  %v2186_v13 = vld [vmem:[%s2715_s1 + $0xe8] sm:$0xff]  ;;  %v2177_v16 = vld [vmem:[%s2715_s1 + $0xa0] sm:$0xff]  ;;  %v2160_v21 = vld [vmem:[%s2715_s1 + $0x18] sm:$0xff] }
  0x10   : > { %v230_v8 = vld [vmem:[%s2382_s6 + $0x10] sm:$0xf]  ;;  %v231_v9 = vld [vmem:[%s2382_s6 + $0x14] sm:$0xf]  ;;  %v226_v10 = vld [vmem:[%s2382_s6] sm:$0xf] }
  0x11   : > { %2253 = vmatpush.bf16.msra.mxu1 %v2163_v2  ;;  %1176 = vmatpush.bf16.msra.mxu0 %v2163_v2  ;;  %238 = vst [vmem:[#allocation2 + $0x90] sm:$0xf] %v230_v8  ;;  %v227_v11 = vld [vmem:[%s2382_s6 + $0x4] sm:$0xf]  ;;  %v1638_v14 = vld [vmem:[%s2382_s6 + $0x48] sm:$0xf] }
  0x12   : > { %1234 = vmatpush.bf16.msra.mxu2 %v2179_v3  ;;  %239 = vst [vmem:[#allocation2 + $0xb4] sm:$0xf] %v231_v9  ;;  %v1639_v15 = vld [vmem:[%s2382_s6 + $0x4c] sm:$0xf]  ;;  %v2185_v17 = vld [vmem:[%s2715_s1 + $0xe0] sm:$0xff]  ;;  %v2176_v23 = vld [vmem:[%s2715_s1 + $0x98] sm:$0xff] }
  0x13   : > { %1263 = vmatpush.bf16.msra.mxu3 %v2187_v5  ;;  %234 = vst [vmem:[#allocation2] sm:$0xf] %v226_v10  ;;  %v232_v18 = vld [vmem:[%s2382_s6 + $0x18] sm:$0xf]  ;;  %v233_v19 = vld [vmem:[%s2382_s6 + $0x1c] sm:$0xf] }
  0x14   : > { %235 = vst [vmem:[#allocation2 + $0x24] sm:$0xf] %v227_v11  ;;  %v228_v20 = vld [vmem:[%s2382_s6 + $0x8] sm:$0xf]  ;;  %v229_v22 = vld [vmem:[%s2382_s6 + $0xc] sm:$0xf] }
  0x15   : > { %2254 = vmatpush.bf16.msra.mxu1 %v2162_v6  ;;  %1177 = vmatpush.bf16.msra.mxu0 %v2162_v6  ;;  %268 = vst [vmem:[#allocation2 + $0x8] sm:$0xf] %v1638_v14  ;;  %v1646_v24 = vld [vmem:[%s2382_s6 + $0x6c] sm:$0xf]  ;;  %v1647_v25 = vld [vmem:[%s2382_s6 + $0x70] sm:$0xf] }
  0x16   : > { %1235 = vmatpush.bf16.msra.mxu2 %v2178_v7  ;;  %269 = vst [vmem:[#allocation2 + $0x2c] sm:$0xf] %v1639_v15  ;;  %v2184_v26 = vld [vmem:[%s2715_s1 + $0xd8] sm:$0xff]  ;;  %v2159_v27 = vld [vmem:[%s2715_s1 + $0x10] sm:$0xff]  ;;  %v2158_v32 = vld [vmem:[%s2715_s1 + $0x8] sm:$0xff] }
  0x17   : > { %1264 = vmatpush.bf16.msra.mxu3 %v2186_v13  ;;  %240 = vst [vmem:[#allocation2 + $0xd8] sm:$0xf] %v232_v18  ;;  %v2175_v28 = vld [vmem:[%s2715_s1 + $0x90] sm:$0xff]  ;;  %v1630_v33 = vld [vmem:[%s2382_s6 + $0x24] sm:$0xf]  ;;  %v2174_v34 = vld [vmem:[%s2715_s1 + $0x88] sm:$0xff] }
  0x18   : > { %241 = vst [vmem:[#allocation2 + $0xfc] sm:$0xf] %v233_v19  ;;  %v1640_v29 = vld [vmem:[%s2382_s6 + $0x50] sm:$0xf]  ;;  %v1641_v30 = vld [vmem:[%s2382_s6 + $0x54] sm:$0xf] }
  0x19   : > { %2255 = vmatpush.bf16.msra.mxu1 %v2161_v12  ;;  %1178 = vmatpush.bf16.msra.mxu0 %v2161_v12  ;;  %236 = vst [vmem:[#allocation2 + $0x48] sm:$0xf] %v228_v20  ;;  %v2183_v31 = vld [vmem:[%s2715_s1 + $0xd0] sm:$0xff]  ;;  %v2157_v35 = vld [vmem:[%s2715_s1] sm:$0xff]  ;;  %v1631_v36 = vld [vmem:[%s2382_s6 + $0x28] sm:$0xf] }
  0x1a   : > { %1236 = vmatpush.bf16.msra.mxu2 %v2177_v16  ;;  %237 = vst [vmem:[#allocation2 + $0x6c] sm:$0xf] %v229_v22  ;;  %v1760_v37 = vld [vmem:[#allocation2 + $0x90] sm:$0xf]  ;;  %v2172_v38 = vld [vmem:[%s2715_s1 + $0x78] sm:$0xff]  ;;  %v2173_v39 = vld [vmem:[%s2715_s1 + $0x80] sm:$0xff] }
  0x1b   : > { %1265 = vmatpush.bf16.msra.mxu3 %v2185_v17  ;;  %285 = vst [vmem:[#allocation2 + $0xc] sm:$0xf] %v1646_v24  ;;  %v2182_v40 = vld [vmem:[%s2715_s1 + $0xc8] sm:$0xff]  ;;  %v2143_v41 = vld [vmem:[#allocation2 + $0xb0] sm:$0xf0]  ;;  %v2196_v44 = vld [vmem:[%s2715_s1 + $0x138] sm:$0xff] }
  0x1c   : > { %286 = vst [vmem:[#allocation2 + $0x30] sm:$0xf] %v1647_v25  ;;  %v1688_v42 = vld [vmem:[#allocation2] sm:$0xf]  ;;  %v2125_v43 = vld [vmem:[#allocation2 + $0x20] sm:$0xf0]  ;;  %v1761_v51 = vor.u32 %v2143_v41, %v1760_v37 }
  0x1d   : > { %2256 = vmatpush.bf16.msra.mxu1 %v2160_v21  ;;  %1179 = vmatpush.bf16.msra.mxu0 %v2160_v21  ;;  %270 = vst [vmem:[#allocation2 + $0x50] sm:$0xf] %v1640_v29  ;;  %v1696_v45 = vld [vmem:[#allocation2 + $0x8] sm:$0xf]  ;;  %v2126_v46 = vld [vmem:[#allocation2 + $0x28] sm:$0xf0]  ;;  %v1689_v53 = vor.u32 %v2125_v43, %v1688_v42 }
  0x1e   : > { %1237 = vmatpush.bf16.msra.mxu2 %v2176_v23  ;;  %271 = vst [vmem:[#allocation2 + $0x74] sm:$0xf] %v1641_v30  ;;  %v2212_v47 = vld [vmem:[%s2715_s1 + $0x1b8] sm:$0xff]  ;;  %v1648_v49 = vld [vmem:[%s2382_s6 + $0x74] sm:$0xf]  ;;  %v1697_v56 = vor.u32 %v2126_v46, %v1696_v45  ;;  %v2181_v57 = vld [vmem:[%s2715_s1 + $0xc0] sm:$0xff] }
  0x1f   : > { %1266 = vmatpush.bf16.msra.mxu3 %v2184_v26  ;;  %251 = vst [vmem:[#allocation2 + $0x4] sm:$0xf] %v1630_v33  ;;  %v1649_v50 = vld [vmem:[%s2382_s6 + $0x78] sm:$0xf]  ;;  %v2171_v52 = vld [vmem:[%s2715_s1 + $0x70] sm:$0xff]  ;;  %v2170_v1 = vld [vmem:[%s2715_s1 + $0x68] sm:$0xff] }
  0x20   : > { %252 = vst [vmem:[#allocation2 + $0x28] sm:$0xf] %v1631_v36  ;;  %v1654_v55 = vld [vmem:[%s2382_s6 + $0x90] sm:$0xf]  ;;  %v2220_v58 = vld [vmem:[%s2715_s1 + $0x1f8] sm:$0xff]  ;;  %v2194_v5 = vld [vmem:[%s2715_s1 + $0x128] sm:$0xff] }
  0x21   : > { %2257 = vmatpush.bf16.msra.mxu1 %v2159_v27  ;;  %1180 = vmatpush.bf16.msra.mxu0 %v2159_v27  ;;  %287 = vst [vmem:[#allocation2 + $0x54] sm:$0xf] %v1648_v49  ;;  %v1655_v59 = vld [vmem:[%s2382_s6 + $0x94] sm:$0xf]  ;;  %v1642_v60 = vld [vmem:[%s2382_s6 + $0x58] sm:$0xf] }
  0x22   : > { %1238 = vmatpush.bf16.msra.mxu2 %v2175_v28  ;;  %v2122_v48 = vld [vmem:[#allocation2 + $0xc] sm:$0xf]  ;;  %288 = vst [vmem:[#allocation2 + $0x78] sm:$0xf] %v1649_v50  ;;  %v1643_v61 = vld [vmem:[%s2382_s6 + $0x5c] sm:$0xf] }
  0x23   : > { %1267 = vmatpush.bf16.msra.mxu3 %v2183_v31  ;;  %v1698_v54 = vld [vmem:[#allocation2 + $0x2c] sm:$0xf0]  ;;  %302 = vst [vmem:[#allocation2 + $0x10] sm:$0xf] %v1654_v55  ;;  %v1632_v3 = vld [vmem:[%s2382_s6 + $0x2c] sm:$0xf] }
  0x24   : > { %v2195_v62 = vld [vmem:[%s2715_s1 + $0x130] sm:$0xff]  ;;  %303 = vst [vmem:[#allocation2 + $0x34] sm:$0xf] %v1655_v59  ;;  %v1701_v0 = vor.u32 %v2122_v48, %v1698_v54  ;;  %v2210_v6 = vld [vmem:[%s2715_s1 + $0x1a8] sm:$0xff]  ;;  %v2169_v7 = vld [vmem:[%s2715_s1 + $0x60] sm:$0xff] }
  0x25   : > { %2258 = vmatpush.bf16.msra.mxu1 %v2158_v32  ;;  %1181 = vmatpush.bf16.msra.mxu0 %v2158_v32  ;;  %v2211_v63 = vld [vmem:[%s2715_s1 + $0x1b0] sm:$0xff]  ;;  %272 = vst [vmem:[#allocation2 + $0x98] sm:$0xf] %v1642_v60  ;;  %v2218_v8 = vld [vmem:[%s2715_s1 + $0x1e8] sm:$0xff]  ;;  %v2193_v9 = vld [vmem:[%s2715_s1 + $0x120] sm:$0xff] }
  0x26   : > { %1239 = vmatpush.bf16.msra.mxu2 %v2174_v34  ;;  %273 = vst [vmem:[#allocation2 + $0xbc] sm:$0xf] %v1643_v61  ;;  %v2219_v2 = vld [vmem:[%s2715_s1 + $0x1f0] sm:$0xff]  ;;  %v2209_v10 = vld [vmem:[%s2715_s1 + $0x1a0] sm:$0xff]  ;;  %v1796_v11 = vld [vmem:[#allocation2 + $0xd8] sm:$0xf] }
  0x27   : > { %1268 = vmatpush.bf16.msra.mxu3 %v2182_v40  ;;  %v1633_v4 = vld [vmem:[%s2382_s6 + $0x30] sm:$0xf]  ;;  %253 = vst [vmem:[#allocation2 + $0x4c] sm:$0xf] %v1632_v3  ;;  %v2168_v12 = vld [vmem:[%s2715_s1 + $0x58] sm:$0xff]  ;;  %v2217_v34 = vld [vmem:[%s2715_s1 + $0x1e0] sm:$0xff] }
  0x28   : > { %254 = vst [vmem:[#allocation2 + $0x70] sm:$0xf] %v1633_v4  ;;  %v2152_v13 = vld [vmem:[#allocation2 + $0xf8] sm:$0xf0]  ;;  %v1724_v14 = vld [vmem:[#allocation2 + $0x48] sm:$0xf] }
  0x29   : > { %2259 = vmatpush.bf16.msra.mxu1 %v2157_v35  ;;  %1182 = vmatpush.bf16.msra.mxu0 %v2157_v35  ;;  %v2134_v15 = vld [vmem:[#allocation2 + $0x68] sm:$0xf0]  ;;  %v2192_v16 = vld [vmem:[%s2715_s1 + $0x118] sm:$0xff]  ;;  %v1732_v17 = vld [vmem:[#allocation2 + $0x50] sm:$0xf]  ;;  %v1797_v22 = vor.u32 %v2152_v13, %v1796_v11 }
  0x2a   : > { %1240 = vmatpush.bf16.msra.mxu2 %v2173_v39  ;;  %v2135_v18 = vld [vmem:[#allocation2 + $0x70] sm:$0xf0]  ;;  %v1650_v20 = vld [vmem:[%s2382_s6 + $0x7c] sm:$0xf]  ;;  %v1651_v21 = vld [vmem:[%s2382_s6 + $0x80] sm:$0xf]  ;;  %v1725_v23 = vor.u32 %v2134_v15, %v1724_v14 }
  0x2b   : > { %1269 = vmatpush.bf16.msra.mxu3 %v2181_v57  ;;  %v2131_v19 = vld [vmem:[#allocation2 + $0x54] sm:$0xf]  ;;  %289 = vst [vmem:[#allocation2 + $0x9c] sm:$0xf] %v1650_v20  ;;  %v1656_v24 = vld [vmem:[%s2382_s6 + $0x98] sm:$0xf]  ;;  %v1733_v26 = vor.u32 %v2135_v18, %v1732_v17 }
  0x2c   : > { %1193 = vmatmul.bf16.vlgmr.msra.gmra.mxu1 %v1761_v51  ;;  %1183 = vmatmul.bf16.vlgmr.msra.gmra.mxu0 %v1689_v53  ;;  %v1657_v25 = vld [vmem:[%s2382_s6 + $0x9c] sm:$0xf]  ;;  %v1734_v27 = vld [vmem:[#allocation2 + $0x74] sm:$0xf0]  ;;  %290 = vst [vmem:[#allocation2 + $0xc0] sm:$0xf] %v1651_v21 }
  0x2d   : > { %1204 = vmatpush.bf16.msrb.mxu1 %v2172_v38  ;;  %1291 = vmatpush.bf16.msrb.mxu0 %v2196_v44  ;;  %v1644_v28 = vld [vmem:[%s2382_s6 + $0x60] sm:$0xf]  ;;  %v2167_v29 = vld [vmem:[%s2715_s1 + $0x50] sm:$0xff]  ;;  %304 = vst [vmem:[#allocation2 + $0x58] sm:$0xf] %v1656_v24  ;;  %v1737_v32 = vor.u32 %v2131_v19, %v1734_v27  ;;  %v2208_v33 = vld [vmem:[%s2715_s1 + $0x198] sm:$0xff] }
  0x2e   : > { %1349 = vmatpush.bf16.msrb.mxu2 %v2212_v47  ;;  %1270 = vmatmul.bf16.vlgmr.msra.gmra.mxu3 %v1701_v0  ;;  %v1645_v30 = vld [vmem:[%s2382_s6 + $0x64] sm:$0xf]  ;;  %v2191_v31 = vld [vmem:[%s2715_s1 + $0x110] sm:$0xff]  ;;  %305 = vst [vmem:[#allocation2 + $0x7c] sm:$0xf] %v1657_v25  ;;  %v2166_v35 = vld [vmem:[%s2715_s1 + $0x48] sm:$0xff] }
  0x2f   : > { %1241 = vmatmul.bf16.vlgmr.msra.gmra.mxu2 %v1697_v56  ;;  %1378 = vmatpush.bf16.msrb.mxu3 %v2220_v58  ;;  %274 = vst [vmem:[#allocation2 + $0xe0] sm:$0xf] %v1644_v28  ;;  %v2207_v36 = vld [vmem:[%s2715_s1 + $0x190] sm:$0xff]  ;;  %v2190_v38 = vld [vmem:[%s2715_s1 + $0x108] sm:$0xff]  ;;  %v2216_v39 = vld [vmem:[%s2715_s1 + $0x1d8] sm:$0xff] }
  0x30   : > { %275 = vst [vmem:[#allocation2 + $0x104] sm:$0xf] %v1645_v30  ;;  %v1634_v37 = vld [vmem:[%s2382_s6 + $0x34] sm:$0xf]  ;;  %v1635_v40 = vld [vmem:[%s2382_s6 + $0x38] sm:$0xf] }
  0x31   : > { %1205 = vmatpush.bf16.msrb.mxu1 %v2171_v52  ;;  %1292 = vmatpush.bf16.msrb.mxu0 %v2195_v62  ;;  %255 = vst [vmem:[#allocation2 + $0x94] sm:$0xf] %v1634_v37  ;;  %v2165_v41 = vld [vmem:[%s2715_s1 + $0x40] sm:$0xff]  ;;  %v2204_v42 = vld [vmem:[%s2715_s1 + $0x178] sm:$0xff]  ;;  %v1690_v46 = vld [vmem:[#allocation2 + $0x24] sm:$0xf0] }
  0x32   : > { %1350 = vmatpush.bf16.msrb.mxu2 %v2211_v63  ;;  %256 = vst [vmem:[#allocation2 + $0xb8] sm:$0xf] %v1635_v40  ;;  %v2189_v43 = vld [vmem:[%s2715_s1 + $0x100] sm:$0xff]  ;;  %v2228_v45 = vld [vmem:[%s2715_s1 + $0x238] sm:$0xff]  ;;  %v1704_v47 = vld [vmem:[#allocation2 + $0x10] sm:$0xf] }
  0x33   : > { %1379 = vmatpush.bf16.msrb.mxu3 %v2219_v2  ;;  %v2121_v44 = vld [vmem:[#allocation2 + $0x4] sm:$0xf]  ;;  %v2127_v48 = vld [vmem:[#allocation2 + $0x30] sm:$0xf0]  ;;  %v1768_v49 = vld [vmem:[#allocation2 + $0x98] sm:$0xf] }
  0x34   : > { %v2144_v50 = vld [vmem:[#allocation2 + $0xb8] sm:$0xf0]  ;;  %v2203_v51 = vld [vmem:[%s2715_s1 + $0x170] sm:$0xff]  ;;  %v1652_v54 = vld [vmem:[%s2382_s6 + $0x84] sm:$0xf]  ;;  %v1693_v56 = vor.u32 %v2121_v44, %v1690_v46  ;;  %v1705_v57 = vor.u32 %v2127_v48, %v1704_v47 }
  0x35   : > { %1206 = vmatpush.bf16.msrb.mxu1 %v2170_v1  ;;  %1293 = vmatpush.bf16.msrb.mxu0 %v2194_v5  ;;  %v2140_v52 = vld [vmem:[#allocation2 + $0x9c] sm:$0xf]  ;;  %v2227_v53 = vld [vmem:[%s2715_s1 + $0x230] sm:$0xff]  ;;  %v1653_v55 = vld [vmem:[%s2382_s6 + $0x88] sm:$0xf]  ;;  %v1769_v60 = vor.u32 %v2144_v50, %v1768_v49 }
  0x36   : > { %1351 = vmatpush.bf16.msrb.mxu2 %v2210_v6  ;;  %291 = vst [vmem:[#allocation2 + $0xe4] sm:$0xf] %v1652_v54  ;;  %v1658_v58 = vld [vmem:[%s2382_s6 + $0xa0] sm:$0xf]  ;;  %v1659_v59 = vld [vmem:[%s2382_s6 + $0xa4] sm:$0xf] }
  0x37   : > { %1380 = vmatpush.bf16.msrb.mxu3 %v2218_v8  ;;  %v1770_v61 = vld [vmem:[#allocation2 + $0xbc] sm:$0xf0]  ;;  %292 = vst [vmem:[#allocation2 + $0x108] sm:$0xf] %v1653_v55  ;;  %v327_v62 = vld [vmem:[%s2382_s6 + $0x4] sm:$0xf] }
  0x38   : > { %306 = vst [vmem:[#allocation2 + $0xa0] sm:$0xf] %v1658_v58  ;;  %v328_v63 = vld [vmem:[%s2382_s6 + $0x8] sm:$0xf]  ;;  %v1773_v2 = vor.u32 %v2140_v52, %v1770_v61  ;;  %v2215_v4 = vld [vmem:[%s2715_s1 + $0x1d0] sm:$0xff]  ;;  %v2205_v5 = vld [vmem:[%s2715_s1 + $0x180] sm:$0xff] }
  0x39   : > { %1207 = vmatpush.bf16.msrb.mxu1 %v2169_v7  ;;  %1294 = vmatpush.bf16.msrb.mxu0 %v2193_v9  ;;  %v2202_v0 = vld [vmem:[%s2715_s1 + $0x168] sm:$0xff]  ;;  %307 = vst [vmem:[#allocation2 + $0xc4] sm:$0xf] %v1659_v59  ;;  %v1636_v6 = vld [vmem:[%s2382_s6 + $0x3c] sm:$0xf]  ;;  %v2201_v8 = vld [vmem:[%s2715_s1 + $0x160] sm:$0xff] }
  0x3a   : > { %1352 = vmatpush.bf16.msrb.mxu2 %v2209_v10  ;;  %v2206_v1 = vld [vmem:[%s2715_s1 + $0x188] sm:$0xff]  ;;  %335 = vst [vmem:[#allocation2 + $0x18] sm:$0xf] %v327_v62  ;;  %v1637_v7 = vld [vmem:[%s2382_s6 + $0x40] sm:$0xf]  ;;  %v2200_v11 = vld [vmem:[%s2715_s1 + $0x158] sm:$0xff] }
  0x3b   : > { %1381 = vmatpush.bf16.msrb.mxu3 %v2217_v34  ;;  %v2575_v3 = vld [vmem:[%s2715_s1 + $0x228] sm:$0xff]  ;;  %336 = vst [vmem:[#allocation2 + $0x3c] sm:$0xf] %v328_v63  ;;  %v2225_v10 = vld [vmem:[%s2715_s1 + $0x220] sm:$0xff]  ;;  %v1726_v13 = vld [vmem:[#allocation2 + $0x6c] sm:$0xf0] }
  0x3c   : > { %1198 = vmatmul.bf16.gmra.mxu1 %v1797_v22  ;;  %1188 = vmatmul.bf16.gmra.mxu0 %v1725_v23  ;;  %v2214_v9 = vld [vmem:[%s2715_s1 + $0x1c8] sm:$0xff]  ;;  %257 = vst [vmem:[#allocation2 + $0xdc] sm:$0xf] %v1636_v6  ;;  %v1740_v14 = vld [vmem:[#allocation2 + $0x58] sm:$0xf]  ;;  %v2199_v18 = vld [vmem:[%s2715_s1 + $0x150] sm:$0xff] }
  0x3d   : > { %1208 = vmatpush.bf16.msrb.mxu1 %v2168_v12  ;;  %1295 = vmatpush.bf16.msrb.mxu0 %v2192_v16  ;;  %258 = vst [vmem:[#allocation2 + $0x100] sm:$0xf] %v1637_v7  ;;  %v2130_v12 = vld [vmem:[#allocation2 + $0x4c] sm:$0xf]  ;;  %v2136_v15 = vld [vmem:[#allocation2 + $0x78] sm:$0xf0] }
  0x3e   : > { %1353 = vmatpush.bf16.msrb.mxu2 %v2208_v33  ;;  %1275 = vmatmul.bf16.gmra.mxu3 %v1737_v32  ;;  %v1804_v16 = vld [vmem:[#allocation2 + $0xe0] sm:$0xf]  ;;  %v2153_v17 = vld [vmem:[#allocation2 + $0x100] sm:$0xf0]  ;;  %v1660_v20 = vld [vmem:[%s2382_s6 + $0xa8] sm:$0xf]  ;;  %v1729_v22 = vor.u32 %v2130_v12, %v1726_v13  ;;  %v1741_v23 = vor.u32 %v2136_v15, %v1740_v14 }
  0x3f   : > { %1246 = vmatmul.bf16.gmra.mxu2 %v1733_v26  ;;  %1382 = vmatpush.bf16.msrb.mxu3 %v2216_v39  ;;  %v2149_v19 = vld [vmem:[#allocation2 + $0xe4] sm:$0xf]  ;;  %v1661_v21 = vld [vmem:[%s2382_s6 + $0xac] sm:$0xf]  ;;  %308 = vst [vmem:[#allocation2 + $0xe8] sm:$0xf] %v1660_v20  ;;  %v1805_v26 = vor.u32 %v2153_v17, %v1804_v16 }
  0x40   : > { %v1670_v24 = vld [vmem:[%s2382_s6 + $0x28] sm:$0xf]  ;;  %v1671_v25 = vld [vmem:[%s2382_s6 + $0x2c] sm:$0xf]  ;;  %309 = vst [vmem:[#allocation2 + $0x10c] sm:$0xf] %v1661_v21 }
  0x41   : > { %1209 = vmatpush.bf16.msrb.mxu1 %v2167_v29  ;;  %1296 = vmatpush.bf16.msrb.mxu0 %v2191_v31  ;;  %v1806_v27 = vld [vmem:[#allocation2 + $0x104] sm:$0xf0]  ;;  %v329_v28 = vld [vmem:[%s2382_s6 + $0xc] sm:$0xf]  ;;  %351 = vst [vmem:[#allocation2 + $0x1c] sm:$0xf] %v1670_v24 }
  0x42   : > { %1354 = vmatpush.bf16.msrb.mxu2 %v2207_v36  ;;  %v330_v29 = vld [vmem:[%s2382_s6 + $0x10] sm:$0xf]  ;;  %352 = vst [vmem:[#allocation2 + $0x40] sm:$0xf] %v1671_v25  ;;  %v1809_v30 = vor.u32 %v2149_v19, %v1806_v27  ;;  %v2198_v31 = vld [vmem:[%s2715_s1 + $0x148] sm:$0xff]  ;;  %v2224_v32 = vld [vmem:[%s2715_s1 + $0x218] sm:$0xff] }
  0x43   : > { %1383 = vmatpush.bf16.msrb.mxu3 %v2215_v4  ;;  %v2213_v33 = vld [vmem:[%s2715_s1 + $0x1c0] sm:$0xff]  ;;  %337 = vst [vmem:[#allocation2 + $0x60] sm:$0xf] %v329_v28  ;;  %v2223_v34 = vld [vmem:[%s2715_s1 + $0x210] sm:$0xff]  ;;  %v1663_v36 = vld [vmem:[%s2382_s6 + $0xb8] sm:$0xf] }
  0x44   : > { %338 = vst [vmem:[#allocation2 + $0x84] sm:$0xf] %v330_v29  ;;  %v2197_v37 = vld [vmem:[%s2715_s1 + $0x140] sm:$0xff]  ;;  %v2139_v39 = vld [vmem:[#allocation2 + $0x94] sm:$0xf] }
  0x45   : > { %1210 = vmatpush.bf16.msrb.mxu1 %v2166_v35  ;;  %1297 = vmatpush.bf16.msrb.mxu0 %v2190_v38  ;;  %v1662_v35 = vld [vmem:[%s2382_s6 + $0xb4] sm:$0xf]  ;;  %320 = vst [vmem:[#allocation2 + $0x38] sm:$0xf] %v1663_v36  ;;  %v2222_v38 = vld [vmem:[%s2715_s1 + $0x208] sm:$0xff] }
  0x46   : > { %1355 = vmatpush.bf16.msrb.mxu2 %v2206_v1  ;;  %319 = vst [vmem:[#allocation2 + $0x14] sm:$0xf] %v1662_v35  ;;  %v1762_v40 = vld [vmem:[#allocation2 + $0xb4] sm:$0xf0]  ;;  %v2128_v44 = vld [vmem:[#allocation2 + $0x38] sm:$0xf0] }
  0x47   : > { %1384 = vmatpush.bf16.msrb.mxu3 %v2214_v9  ;;  %v1672_v46 = vld [vmem:[%s2382_s6 + $0x30] sm:$0xf]  ;;  %v1673_v47 = vld [vmem:[%s2382_s6 + $0x34] sm:$0xf]  ;;  %v1765_v48 = vor.u32 %v2139_v39, %v1762_v40  ;;  %v1678_v50 = vld [vmem:[%s2382_s6 + $0x4c] sm:$0xf] }
  0x48   : > { %353 = vst [vmem:[#allocation2 + $0x64] sm:$0xf] %v1672_v46  ;;  %v331_v54 = vld [vmem:[%s2382_s6 + $0x14] sm:$0xf]  ;;  %v332_v55 = vld [vmem:[%s2382_s6 + $0x18] sm:$0xf] }
  0x49   : > { %1211 = vmatpush.bf16.msrb.mxu1 %v2165_v41  ;;  %1298 = vmatpush.bf16.msrb.mxu0 %v2189_v43  ;;  %v1776_v41 = vld [vmem:[#allocation2 + $0xa0] sm:$0xf]  ;;  %v1712_v43 = vld [vmem:[#allocation2 + $0x18] sm:$0xf]  ;;  %354 = vst [vmem:[#allocation2 + $0x88] sm:$0xf] %v1673_v47 }
  0x4a   : > { %1356 = vmatpush.bf16.msrb.mxu2 %v2205_v5  ;;  %v1713_v52 = vor.u32 %v2128_v44, %v1712_v43  ;;  %367 = vst [vmem:[#allocation2 + $0x20] sm:$0xf] %v1678_v50  ;;  %v1664_v58 = vld [vmem:[%s2382_s6 + $0xbc] sm:$0xf]  ;;  %v1665_v59 = vld [vmem:[%s2382_s6 + $0xc0] sm:$0xf] }
  0x4b   : > { %1385 = vmatpush.bf16.msrb.mxu3 %v2213_v33  ;;  %339 = vst [vmem:[#allocation2 + $0xa8] sm:$0xf] %v331_v54  ;;  %v1798_v61 = vld [vmem:[#allocation2 + $0xfc] sm:$0xf0]  ;;  %v1812_v62 = vld [vmem:[#allocation2 + $0xe8] sm:$0xf] }
  0x4c   : > { %1212 = vmatmul.bf16.vlgmr.msrb.gmra.mxu1 %v1693_v56  ;;  %1299 = vmatmul.bf16.vlgmr.msrb.gmra.mxu0 %v1705_v57  ;;  %v2221_v57 = vld [vmem:[%s2715_s1 + $0x200] sm:$0xff]  ;;  %340 = vst [vmem:[#allocation2 + $0xcc] sm:$0xf] %v332_v55  ;;  %v2154_v63 = vld [vmem:[#allocation2 + $0x108] sm:$0xf0] }
  0x4d   : > { %1320 = vmatpush.bf16.msra.mxu1 %v2204_v42  ;;  %1407 = vmatpush.bf16.msra.mxu0 %v2228_v45  ;;  %v2145_v42 = vld [vmem:[#allocation2 + $0xc0] sm:$0xf0]  ;;  %321 = vst [vmem:[#allocation2 + $0x5c] sm:$0xf] %v1664_v58  ;;  %v1680_v4 = vld [vmem:[%s2382_s6 + $0x54] sm:$0xf]  ;;  %v1813_v6 = vor.u32 %v2154_v63, %v1812_v62 }
  0x4e   : > { %1280 = vmatmul.bf16.gmra.mxu3 %v1773_v2  ;;  %2260 = vmatpush.bf16.msra.mxu2 %v2228_v45  ;;  %v2124_v45 = vld [vmem:[#allocation2 + $0x1c] sm:$0xf]  ;;  %v1777_v49 = vor.u32 %v2145_v42, %v1776_v41  ;;  %322 = vst [vmem:[#allocation2 + $0x80] sm:$0xf] %v1665_v59  ;;  %v2137_v1 = vld [vmem:[#allocation2 + $0x80] sm:$0xf0] }
  0x4f   : > { %1251 = vmatmul.bf16.gmra.mxu2 %v1769_v60  ;;  %v2148_v60 = vld [vmem:[#allocation2 + $0xdc] sm:$0xf]  ;;  %v1674_v2 = vld [vmem:[%s2382_s6 + $0x38] sm:$0xf]  ;;  %v2133_v7 = vld [vmem:[#allocation2 + $0x64] sm:$0xf] }
  0x50   : > { %v1801_v5 = vor.u32 %v2148_v60, %v1798_v61  ;;  %355 = vst [vmem:[#allocation2 + $0xac] sm:$0xf] %v1674_v2  ;;  %v334_v12 = vld [vmem:[%s2382_s6 + $0x20] sm:$0xf]  ;;  %v1666_v14 = vld [vmem:[%s2382_s6 + $0xc4] sm:$0xf] }
  0x51   : > { %1321 = vmatpush.bf16.msra.mxu1 %v2203_v51  ;;  %1408 = vmatpush.bf16.msra.mxu0 %v2227_v53  ;;  %v1679_v51 = vld [vmem:[%s2382_s6 + $0x50] sm:$0xf]  ;;  %369 = vst [vmem:[#allocation2 + $0x68] sm:$0xf] %v1680_v4  ;;  %v1667_v15 = vld [vmem:[%s2382_s6 + $0xc8] sm:$0xf] }
  0x52   : > { %2261 = vmatpush.bf16.msra.mxu2 %v2227_v53  ;;  %v1714_v53 = vld [vmem:[#allocation2 + $0x3c] sm:$0xf0]  ;;  %368 = vst [vmem:[#allocation2 + $0x44] sm:$0xf] %v1679_v51  ;;  %v2123_v16 = vld [vmem:[#allocation2 + $0x14] sm:$0xf] }
  0x53   : > { %v1717_v56 = vor.u32 %v2124_v45, %v1714_v53  ;;  %342 = vst [vmem:[#allocation2 + $0x114] sm:$0xf] %v334_v12  ;;  %v1706_v17 = vld [vmem:[#allocation2 + $0x34] sm:$0xf0]  ;;  %v1784_v20 = vld [vmem:[#allocation2 + $0xa8] sm:$0xf] }
  0x54   : > { %323 = vst [vmem:[#allocation2 + $0xa4] sm:$0xf] %v1666_v14  ;;  %v2146_v21 = vld [vmem:[#allocation2 + $0xc8] sm:$0xf0]  ;;  %v1682_v24 = vld [vmem:[%s2382_s6 + $0x5c] sm:$0xf]  ;;  %v1709_v25 = vor.u32 %v2123_v16, %v1706_v17 }
  0x55   : > { %1322 = vmatpush.bf16.msra.mxu1 %v2202_v0  ;;  %1409 = vmatpush.bf16.msra.mxu0 %v2575_v3  ;;  %v1748_v0 = vld [vmem:[#allocation2 + $0x60] sm:$0xf]  ;;  %324 = vst [vmem:[#allocation2 + $0xc8] sm:$0xf] %v1667_v15  ;;  %v1785_v29 = vor.u32 %v2146_v21, %v1784_v20  ;;  %v1669_v35 = vld [vmem:[%s2382_s6 + $0xd0] sm:$0xf] }
  0x56   : > { %2262 = vmatpush.bf16.msra.mxu2 %v2575_v3  ;;  %v1675_v3 = vld [vmem:[%s2382_s6 + $0x3c] sm:$0xf]  ;;  %v1749_v9 = vor.u32 %v2137_v1, %v1748_v0  ;;  %v1683_v28 = vld [vmem:[%s2382_s6 + $0x60] sm:$0xf]  ;;  %371 = vst [vmem:[#allocation2 + $0xb0] sm:$0xf] %v1682_v24 }
  0x57   : > { %356 = vst [vmem:[#allocation2 + $0xd0] sm:$0xf] %v1675_v3  ;;  %v2142_v27 = vld [vmem:[#allocation2 + $0xac] sm:$0xf]  ;;  %v2132_v36 = vld [vmem:[#allocation2 + $0x5c] sm:$0xf] }
  0x58   : > { %372 = vst [vmem:[#allocation2 + $0xd4] sm:$0xf] %v1683_v28 }
  0x59   : > { %1323 = vmatpush.bf16.msra.mxu1 %v2201_v8  ;;  %1410 = vmatpush.bf16.msra.mxu0 %v2225_v10  ;;  %v1681_v8 = vld [vmem:[%s2382_s6 + $0x58] sm:$0xf]  ;;  %v2129_v19 = vld [vmem:[#allocation2 + $0x40] sm:$0xf0]  ;;  %326 = vst [vmem:[#allocation2 + $0x110] sm:$0xf] %v1669_v35 }
  0x5a   : > { %2263 = vmatpush.bf16.msra.mxu2 %v2225_v10  ;;  %v1750_v10 = vld [vmem:[#allocation2 + $0x84] sm:$0xf0]  ;;  %370 = vst [vmem:[#allocation2 + $0x8c] sm:$0xf] %v1681_v8  ;;  %v2155_v41 = vld [vmem:[#allocation2 + $0x110] sm:$0xf0] }
  0x5b   : > { %v1753_v13 = vor.u32 %v2133_v7, %v1750_v10 }
  0x5c   : > { %1217 = vmatmul.bf16.gmra.mxu1 %v1729_v22  ;;  %1304 = vmatmul.bf16.gmra.mxu0 %v1741_v23  ;;  %v1676_v22 = vld [vmem:[%s2382_s6 + $0x40] sm:$0xf]  ;;  %v1677_v23 = vld [vmem:[%s2382_s6 + $0x44] sm:$0xf] }
  0x5d   : > { %1324 = vmatpush.bf16.msra.mxu1 %v2200_v11  ;;  %1411 = vmatpush.bf16.msra.mxu0 %v2224_v32  ;;  %v333_v11 = vld [vmem:[%s2382_s6 + $0x1c] sm:$0xf]  ;;  %357 = vst [vmem:[#allocation2 + $0xf4] sm:$0xf] %v1676_v22  ;;  %v1792_v50 = vld [vmem:[#allocation2 + $0xb0] sm:$0xf] }
  0x5e   : > { %1285 = vmatmul.bf16.gmra.mxu3 %v1809_v30  ;;  %2264 = vmatpush.bf16.msra.mxu2 %v2224_v32  ;;  %341 = vst [vmem:[#allocation2 + $0xf0] sm:$0xf] %v333_v11  ;;  %v1786_v30 = vld [vmem:[#allocation2 + $0xcc] sm:$0xf0]  ;;  %v1685_v32 = vld [vmem:[%s2382_s6 + $0x68] sm:$0xf] }
  0x5f   : > { %1256 = vmatmul.bf16.gmra.mxu2 %v1805_v26  ;;  %358 = vst [vmem:[#allocation2 + $0x118] sm:$0xf] %v1677_v23  ;;  %v1789_v33 = vor.u32 %v2142_v27, %v1786_v30  ;;  %v2147_v51 = vld [vmem:[#allocation2 + $0xd0] sm:$0xf0] }
  0x60   : > { %374 = vst [vmem:[#allocation2 + $0x11c] sm:$0xf] %v1685_v32  ;;  %v1793_v55 = vor.u32 %v2147_v51, %v1792_v50  ;;  %v1814_v0 = vld [vmem:[#allocation2 + $0x10c] sm:$0xf0] }
  0x61   : > { %1325 = vmatpush.bf16.msra.mxu1 %v2199_v18  ;;  %1412 = vmatpush.bf16.msra.mxu0 %v2223_v34  ;;  %v1720_v18 = vld [vmem:[#allocation2 + $0x20] sm:$0xf]  ;;  %v2138_v39 = vld [vmem:[#allocation2 + $0x88] sm:$0xf0] }
  0x62   : > { %2265 = vmatpush.bf16.msra.mxu2 %v2223_v34  ;;  %v1721_v26 = vor.u32 %v2129_v19, %v1720_v18  ;;  %v1668_v34 = vld [vmem:[%s2382_s6 + $0xcc] sm:$0xf] }
  0x63   : > { %325 = vst [vmem:[#allocation2 + $0xec] sm:$0xf] %v1668_v34 }
  0x64   : > { %v2151_v45 = vld [vmem:[#allocation2 + $0xf4] sm:$0xf] }
  0x65   : > { %1326 = vmatpush.bf16.msra.mxu1 %v2198_v31  ;;  %1413 = vmatpush.bf16.msra.mxu0 %v2222_v38  ;;  %v1684_v31 = vld [vmem:[%s2382_s6 + $0x64] sm:$0xf]  ;;  %v1820_v40 = vld [vmem:[#allocation2 + $0xf0] sm:$0xf]  ;;  %s2120_s6 = sshll.u32 %s2723_s12, 5 }
  0x66   : > { %2266 = vmatpush.bf16.msra.mxu2 %v2222_v38  ;;  %373 = vst [vmem:[#allocation2 + $0xf8] sm:$0xf] %v1684_v31  ;;  %v1756_v38 = vld [vmem:[#allocation2 + $0x68] sm:$0xf]  ;;  %v1821_v44 = vor.u32 %v2155_v41, %v1820_v40  ;;  %v1822_v46 = vld [vmem:[#allocation2 + $0x114] sm:$0xf0]  ;;  %s2684_s7 = scalar_lea.vmem %s2716_s2, %s2120_s6 }
  0x67   : > { %v1757_v43 = vor.u32 %v2138_v39, %v1756_v38  ;;  %v1825_v47 = vor.u32 %v2151_v45, %v1822_v46  ;;  %v2156_v53 = vld [vmem:[#allocation2 + $0x118] sm:$0xf0] }
  0x69   : > { %1327 = vmatpush.bf16.msra.mxu1 %v2197_v37  ;;  %1414 = vmatpush.bf16.msra.mxu0 %v2221_v57  ;;  %v1742_v37 = vld [vmem:[#allocation2 + $0x7c] sm:$0xf0] }
  0x6a   : > { %2267 = vmatpush.bf16.msra.mxu2 %v2221_v57  ;;  %v1745_v42 = vor.u32 %v2132_v36, %v1742_v37  ;;  %v2150_v63 = vld [vmem:[#allocation2 + $0xec] sm:$0xf] }
  0x6b   : > { %v1817_v1 = vor.u32 %v2150_v63, %v1814_v0 }
  0x6c   : > { %1222 = vmatmul.bf16.gmra.mxu1 %v1765_v48  ;;  %1309 = vmatmul.bf16.gmra.mxu0 %v1777_v49  ;;  %v2141_v48 = vld [vmem:[#allocation2 + $0xa4] sm:$0xf]  ;;  %v1778_v49 = vld [vmem:[#allocation2 + $0xc4] sm:$0xf0] }
  0x6d   : > { %v1781_v54 = vor.u32 %v2141_v48, %v1778_v49 }
  0x6e   : > { %1386 = vmatmul.bf16.vlgmr.msrb.gmra.mxu3 %v1717_v56 }
  0x6f   : > { %1357 = vmatmul.bf16.vlgmr.msrb.gmra.mxu2 %v1713_v52  ;;  %v1828_v52 = vld [vmem:[#allocation2 + $0xf8] sm:$0xf] }
  0x70   : > { %v1829_v58 = vor.u32 %v2156_v53, %v1828_v52 }
  0x7c   : > { %1227 = vmatmul.bf16.gmra.mxu1 %v1801_v5  ;;  %1314 = vmatmul.bf16.gmra.mxu0 %v1813_v6 }
  0x7e   : > { %1391 = vmatmul.bf16.gmra.mxu3 %v1753_v13 }
  0x7f   : > { %1362 = vmatmul.bf16.gmra.mxu2 %v1749_v9 }
  0x8c   : > { %1328 = vmatmul.bf16.vlgmr.msra.gmra.mxu1 %v1709_v25  ;;  %1415 = vmatmul.bf16.vlgmr.msra.gmra.mxu0 %v1721_v26 }
  0x8e   : > { %1396 = vmatmul.bf16.gmra.mxu3 %v1789_v33 }
  0x8f   : > { %1367 = vmatmul.bf16.gmra.mxu2 %v1785_v29 }
  0x9c   : > { %1333 = vmatmul.bf16.gmra.mxu1 %v1745_v42  ;;  %1420 = vmatmul.bf16.gmra.mxu0 %v1757_v43 }
  0x9e   : > { %1401 = vmatmul.bf16.gmra.mxu3 %v1825_v47 }
  0x9f   : > { %1372 = vmatmul.bf16.gmra.mxu2 %v1821_v44 }
  0xa9   : > { %v1194_v56 = vpop.f32.mrf.mxu1  ;;  %v1184_v57 = vpop.f32.mrf.mxu0 }
  0xac   : > { %1338 = vmatmul.bf16.gmra.mxu1 %v1781_v54  ;;  %1425 = vmatmul.bf16.gmra.mxu0 %v1793_v55 }
  0xaf   : > { %1430 = vmatmul.bf16.vlgmr.msra.gmra.mxu2 %v1829_v58 }
  0xb1   : > { %v1196_v60 = vpop.f32.mrf.mxu1  ;;  %v1186_v61 = vpop.f32.mrf.mxu0 }
  0xb2   : > { %v1242_v59 = vpop.f32.mrf.mxu2  ;;  %v1271_v62 = vpop.f32.mrf.mxu3 }
  0xb9   : > { %v1199_v3 = vpop.f32.mrf.mxu1  ;;  %v1189_v4 = vpop.f32.mrf.mxu0 }
  0xba   : > { %v1244_v2 = vpop.f32.mrf.mxu2  ;;  %v2655_v5 = vpop.f32.mrf.mxu3 }
  0xbc   : > { %1343 = vmatmul.bf16.gmra.mxu1 %v1817_v1 }
  0xc1   : > { %v1201_v7 = vpop.f32.mrf.mxu1  ;;  %v1191_v8 = vpop.f32.mrf.mxu0 }
  0xc2   : > { %v1247_v6 = vpop.f32.mrf.mxu2  ;;  %v1276_v9 = vpop.f32.mrf.mxu3 }
  0xc9   : > { %v1213_v11 = vpop.f32.mrf.mxu1  ;;  %v1300_v12 = vpop.f32.mrf.mxu0 }
  0xca   : > { %v1249_v10 = vpop.f32.mrf.mxu2  ;;  %v1214_v13 = vadd.f32 %v1213_v11, %v1184_v57  ;;  %v2657_v15 = vpop.f32.mrf.mxu3 }
  0xcc   : > { %v1243_v14 = vadd.f32 %v1242_v59, %v1214_v13 }
  0xce   : > { %v1272_v16 = vadd.f32 %v1271_v62, %v1243_v14 }
  0xd0   : > { %v1301_v17 = vadd.f32 %v1300_v12, %v1272_v16 }
  0xd1   : > { %v1215_v19 = vpop.f32.mrf.mxu1  ;;  %v1302_v20 = vpop.f32.mrf.mxu0 }
  0xd2   : > { %v1252_v18 = vpop.f32.mrf.mxu2  ;;  %v1216_v21 = vadd.f32 %v1215_v19, %v1186_v61  ;;  %v1281_v23 = vpop.f32.mrf.mxu3 }
  0xd4   : > { %v1245_v22 = vadd.f32 %v1244_v2, %v1216_v21 }
  0xd9   : > { %v1218_v25 = vpop.f32.mrf.mxu1  ;;  %v1305_v26 = vpop.f32.mrf.mxu0 }
  0xda   : > { %v1254_v24 = vpop.f32.mrf.mxu2  ;;  %v1219_v27 = vadd.f32 %v1218_v25, %v1189_v4  ;;  %v2659_v32 = vpop.f32.mrf.mxu3  ;;  %v1274_v4 = vadd.f32 %v2655_v5, %v1245_v22 }
  0xdc   : > { %v1248_v28 = vadd.f32 %v1247_v6, %v1219_v27 }
  0xde   : > { %v1277_v29 = vadd.f32 %v1276_v9, %v1248_v28 }
  0xe0   : > { %v1306_v30 = vadd.f32 %v1305_v26, %v1277_v29 }
  0xe1   : > { %v1220_v33 = vpop.f32.mrf.mxu1  ;;  %v1307_v34 = vpop.f32.mrf.mxu0 }
  0xe2   : > { %v1257_v31 = vpop.f32.mrf.mxu2  ;;  %v1221_v35 = vadd.f32 %v1220_v33, %v1191_v8  ;;  %v2661_v41 = vpop.f32.mrf.mxu3 }
  0xe4   : > { %v1250_v36 = vadd.f32 %v1249_v10, %v1221_v35 }
  0xe9   : > { %v1223_v38 = vpop.f32.mrf.mxu1  ;;  %v1310_v39 = vpop.f32.mrf.mxu0 }
  0xea   : > { %v1259_v37 = vpop.f32.mrf.mxu2  ;;  %v1224_v40 = vadd.f32 %v1223_v38, %v1194_v56  ;;  %v2669_v50 = vpop.f32.mrf.mxu3 }
  0xec   : > { %v1253_v42 = vadd.f32 %v1252_v18, %v1224_v40 }
  0xee   : > { %v1282_v43 = vadd.f32 %v1281_v23, %v1253_v42 }
  0xf0   : > { %v2663_v44 = vadd.f32 %v1310_v39, %v1282_v43 }
  0xf1   : > { %v1225_v46 = vpop.f32.mrf.mxu1  ;;  %v2665_v47 = vpop.f32.mrf.mxu0 }
  0xf2   : > { %v1358_v45 = vpop.f32.mrf.mxu2  ;;  %v1226_v48 = vadd.f32 %v1225_v46, %v1196_v60  ;;  %v1387_v56 = vpop.f32.mrf.mxu3 }
  0xf4   : > { %v2667_v49 = vadd.f32 %v1254_v24, %v1226_v48  ;;  %v1279_v24 = vadd.f32 %v2657_v15, %v1250_v36 }
  0xf9   : > { %v1228_v52 = vpop.f32.mrf.mxu1  ;;  %v2671_v53 = vpop.f32.mrf.mxu0 }
  0xfa   : > { %v1360_v51 = vpop.f32.mrf.mxu2  ;;  %v1229_v54 = vadd.f32 %v1228_v52, %v1199_v3  ;;  %v1389_v60 = vpop.f32.mrf.mxu3  ;;  %v1303_v3 = vadd.f32 %v1302_v20, %v1274_v4 }
  0xfc   : > { %v2673_v55 = vadd.f32 %v1257_v31, %v1229_v54  ;;  %v1308_v31 = vadd.f32 %v1307_v34, %v1279_v24 }
 0x101   : > { %v1230_v58 = vpop.f32.mrf.mxu1  ;;  %v2675_v59 = vpop.f32.mrf.mxu0 }
 0x102   : > { %v1363_v57 = vpop.f32.mrf.mxu2  ;;  %v1231_v61 = vadd.f32 %v1230_v58, %v1201_v7  ;;  %v1392_v12 = vpop.f32.mrf.mxu3 }
 0x104   : > { %v2677_v62 = vadd.f32 %v1259_v37, %v1231_v61 }
 0x109   : > { %v1329_v63 = vpop.f32.mrf.mxu1  ;;  %v1416_v0 = vpop.f32.mrf.mxu0 }
 0x10a   : > { %v1330_v1 = vadd.f32 %v1329_v63, %v1301_v17  ;;  %v1365_v2 = vpop.f32.mrf.mxu2  ;;  %v1394_v27 = vpop.f32.mrf.mxu3 }
 0x10c   : > { %v1359_v6 = vadd.f32 %v1358_v45, %v1330_v1 }
 0x10e   : > { %v1388_v8 = vadd.f32 %v1387_v56, %v1359_v6  ;;  %v1284_v56 = vadd.f32 %v2659_v32, %v2667_v49 }
 0x110   : > { %v1417_v14 = vadd.f32 %v1416_v0, %v1388_v8 }
 0x111   : > { %v1331_v9 = vpop.f32.mrf.mxu1  ;;  %v1418_v10 = vpop.f32.mrf.mxu0 }
 0x112   : > { %v1332_v11 = vadd.f32 %v1331_v9, %v1303_v3  ;;  %v1368_v7 = vpop.f32.mrf.mxu2  ;;  %v1466_v19 = vmul.f32 %v1417_v14, %v1417_v14 }
 0x114   : > { %v1361_v13 = vadd.f32 %v1360_v51, %v1332_v11 }
 0x116   : > { %v1390_v16 = vadd.f32 %v1389_v60, %v1361_v13  ;;  %v1313_v60 = vadd.f32 %v2665_v47, %v1284_v56 }
 0x118   : > { %v1419_v18 = vadd.f32 %v1418_v10, %v1390_v16 }
 0x119   : > { %v1334_v5 = vpop.f32.mrf.mxu1  ;;  %v1421_v17 = vpop.f32.mrf.mxu0 }
 0x11a   : > { %v2232_v20 = vpack.c.bf16 %v1419_v18, %v1417_v14  ;;  %v1452_v21 = vadd.f32 %v1419_v18, %v1417_v14  ;;  %v1467_v22 = vmul.f32 %v1419_v18, %v1419_v18  ;;  %v1335_v23 = vadd.f32 %v1334_v5, %v1306_v30  ;;  %v1370_v29 = vpop.f32.mrf.mxu2  ;;  %v1397_v30 = vpop.f32.mrf.mxu3 }
 0x11b   : > { %v1289_v18 = vadd.f32 %v2669_v50, %v2677_v62 }
 0x11c   : > { %2233 = vst [vmem:[%s2684_s7] sm:$0xff] %v2232_v20   ;;  %v1474_v25 = vadd.f32 %v1467_v22, %v1466_v19  ;;  %v1364_v26 = vadd.f32 %v1363_v57, %v1335_v23 }
 0x11e   : > { %v1393_v28 = vadd.f32 %v1392_v12, %v1364_v26 }
 0x120   : > { %v1422_v33 = vadd.f32 %v1421_v17, %v1393_v28  ;;  %v1318_v17 = vadd.f32 %v2675_v59, %v1289_v18 }
 0x121   : > { %v1336_v35 = vpop.f32.mrf.mxu1  ;;  %v1423_v37 = vpop.f32.mrf.mxu0 }
 0x122   : > { %v1453_v38 = vadd.f32 %v1452_v21, %v1422_v33  ;;  %v1468_v39 = vmul.f32 %v1422_v33, %v1422_v33  ;;  %v1337_v40 = vadd.f32 %v1336_v35, %v1308_v31  ;;  %v1373_v15 = vpop.f32.mrf.mxu2  ;;  %v1399_v0 = vpop.f32.mrf.mxu3 }
 0x124   : > { %v1475_v42 = vadd.f32 %v1474_v25, %v1468_v39  ;;  %v1366_v43 = vadd.f32 %v1365_v2, %v1337_v40 }
 0x126   : > { %v1395_v45 = vadd.f32 %v1394_v27, %v1366_v43 }
 0x128   : > { %v1424_v46 = vadd.f32 %v1423_v37, %v1395_v45 }
 0x129   : > { %v1339_v36 = vpop.f32.mrf.mxu1  ;;  %v1426_v34 = vpop.f32.mrf.mxu0 }
 0x12a   : > { %v2237_v48 = vpack.c.bf16 %v1424_v46, %v1422_v33  ;;  %v1454_v51 = vadd.f32 %v1453_v38, %v1424_v46  ;;  %v1469_v52 = vmul.f32 %v1424_v46, %v1424_v46  ;;  %v1340_v54 = vadd.f32 %v1339_v36, %v2663_v44  ;;  %v1375_v3 = vpop.f32.mrf.mxu2  ;;  %v1402_v16 = vpop.f32.mrf.mxu3 }
 0x12b   : > { %v1287_v44 = vadd.f32 %v2661_v41, %v2673_v55 }
 0x12c   : > { %2249 = vst [vmem:[%s2684_s7 + $0x8] sm:$0xff] %v2237_v48   ;;  %v1476_v57 = vadd.f32 %v1475_v42, %v1469_v52  ;;  %v1369_v58 = vadd.f32 %v1368_v7, %v1340_v54 }
 0x12d   : > { %v1316_v10 = vadd.f32 %v2671_v53, %v1287_v44 }
 0x12e   : > { %v1398_v61 = vadd.f32 %v1397_v30, %v1369_v58 }
 0x130   : > { %v1427_v63 = vadd.f32 %v1426_v34, %v1398_v61 }
 0x131   : > { %v1341_v1 = vpop.f32.mrf.mxu1  ;;  %v1428_v32 = vpop.f32.mrf.mxu0 }
 0x132   : > { %v1455_v2 = vadd.f32 %v1454_v51, %v1427_v63  ;;  %v1470_v4 = vmul.f32 %v1427_v63, %v1427_v63  ;;  %v1342_v6 = vadd.f32 %v1341_v1, %v1313_v60  ;;  %v1431_v41 = vpop.f32.mrf.mxu2  ;;  %v1404_v26 = vpop.f32.mrf.mxu3 }
 0x134   : > { %v1477_v8 = vadd.f32 %v1476_v57, %v1470_v4  ;;  %v1371_v9 = vadd.f32 %v1370_v29, %v1342_v6 }
 0x136   : > { %v1400_v49 = vadd.f32 %v1399_v0, %v1371_v9 }
 0x138   : > { %v1429_v11 = vadd.f32 %v1428_v32, %v1400_v49 }
 0x139   : > { %v1344_v12 = vpop.f32.mrf.mxu1 }
 0x13a   : > { %v2242_v47 = vpack.c.bf16 %v1429_v11, %v1427_v63  ;;  %v1456_v13 = vadd.f32 %v1455_v2, %v1429_v11  ;;  %v1471_v14 = vmul.f32 %v1429_v11, %v1429_v11  ;;  %v1345_v7 = vadd.f32 %v1344_v12, %v1316_v10  ;;  %v1433_v28 = vpop.f32.mrf.mxu2 }
 0x13c   : > { %2250 = vst [vmem:[%s2684_s7 + $0x10] sm:$0xff] %v2242_v47   ;;  %v1478_v19 = vadd.f32 %v1477_v8, %v1471_v14  ;;  %v1374_v5 = vadd.f32 %v1373_v15, %v1345_v7 }
 0x13e   : > { %v1403_v55 = vadd.f32 %v1402_v16, %v1374_v5 }
 0x140   : > { %v1432_v20 = vadd.f32 %v1431_v41, %v1403_v55 }
 0x141   : > { %v1346_v53 = vpop.f32.mrf.mxu1 }
 0x142   : > { %v1457_v21 = vadd.f32 %v1456_v13, %v1432_v20  ;;  %v1472_v22 = vmul.f32 %v1432_v20, %v1432_v20  ;;  %v1347_v23 = vadd.f32 %v1346_v53, %v1318_v17 }
 0x144   : > { %v1479_v24 = vadd.f32 %v1478_v19, %v1472_v22  ;;  %v1376_v25 = vadd.f32 %v1375_v3, %v1347_v23 }
 0x146   : > { %v1405_v27 = vadd.f32 %v1404_v26, %v1376_v25 }
 0x148   : > { %v1434_v50 = vadd.f32 %v1433_v28, %v1405_v27 }
 0x14a   : > { %v2247_v62 = vpack.c.bf16 %v1434_v50, %v1432_v20  ;;  %v1458_v29 = vadd.f32 %v1457_v21, %v1434_v50  ;;  %v1473_v31 = vmul.f32 %v1434_v50, %v1434_v50 }
 0x14c   : > { %2251 = vst [vmem:[%s2684_s7 + $0x18] sm:$0xff] %v2247_v62   ;;  %v1459_v33 = vrot.slane %v1458_v29, 4  ;;  %v1480_v35 = vadd.f32 %v1479_v24, %v1473_v31 }
 0x14e   : > { %v1460_v37 = vadd.f32 %v1459_v33, %v1458_v29  ;;  %v1481_v59 = vrot.slane %v1480_v35, 4 }
 0x150   : > { %v1461_v38 = vrot.slane %v1460_v37, 2  ;;  %v1482_v39 = vadd.f32 %v1481_v59, %v1480_v35 }
 0x152   : > { %v1462_v40 = vadd.f32 %v1461_v38, %v1460_v37  ;;  %v1483_v42 = vrot.slane %v1482_v39, 2 }
 0x154   : > { %v1463_v43 = vrot.slane %v1462_v40, 1  ;;  %v1484_v45 = vadd.f32 %v1483_v42, %v1482_v39 }
 0x156   : > { %v1464_v30 = vadd.f32 %v1463_v43, %v1462_v40  ;;  %v1485_v46 = vrot.slane %v1484_v45, 1 }
 0x158   : > { %1465 = vst [vmem:[%s225_s11] sm:$0x1] %v1464_v30  ;;  %v1486_v15 = vadd.f32 %v1485_v46, %v1484_v45 }
 0x15a   : > { %1487 = vst [vmem:[%s225_s11 + $0x1] sm:$0x1] %v1486_v15 }
 0x15b PF: > { %s14_s14 = sadd.s32 1, %s2315_s14   ;;  %s2718_s12 = smov %s2311_s13 }
 0x15c   : > { %p11_p5 = scmp.ge.s32.totalorder %s14_s14, 4   ;;  %s2719_s13 = smov %s2721_s15 }
 0x15e   :  { %13 = sbr.rel (!%p11_p5) target bundleno = 2 (0x2), region = 75 }

</bundles_post_ra>
